<compile_context>
chip_gen: v7x
topology: tpu7x:2x2x1
jax: 0.10.0
libtpu: 0.0.40
codegen_flags: <defaults>
</compile_context>

<pallas_src>
from functools import partial

import jax
import jax.numpy as jnp
from jax import lax
from jax.experimental import pallas as pl
from jax.experimental.pallas import tpu as pltpu


def _round_up(x, m):
    return ((x + m - 1) // m) * m


def _vmem_capacity_bytes():
    """Per-core VMEM capacity; conservative v7x default (64 MiB) if the query fails."""
    try:
        info = pltpu.get_tpu_info()
        cap = int(getattr(info, "vmem_capacity_bytes", 0))
        if cap > 0:
            return cap
    except Exception:
        pass
    return 64 * 2**20


# ----------------------------- Pallas kernel ------------------------------ #

def cknet_kernel(*refs, hidden_layers, unroll_limit=8):
    """Whole SIREN MLP + final linear for one tile of lane-packed coordinate rows."""
    if hidden_layers > 0:
        (coords_ref, w1_ref, b1_ref, wh_ref, bh_ref,
         wf_ref, bf_ref, out_ref) = refs
    else:
        coords_ref, w1_ref, b1_ref, wf_ref, bf_ref, out_ref = refs
        wh_ref = bh_ref = None

    # First SIREN layer as a single shallow MXU dot (K = G*F).  omega_0 is already
    # folded into w1/b1 by prepare_cknet_params; the MXU is otherwise idle here.
    x = coords_ref[...]                                             # (tn, G*F) f32
    w1 = w1_ref[...]                                                # (G*F, Hp)
    pre = jnp.dot(x.astype(w1.dtype), w1,
                  preferred_element_type=jnp.float32) + b1_ref[...]
    h = jnp.sin(pre)                                                # (tn, Hp)

    # Hidden SIREN layers: block-diagonal packed weights -> full 128-lane dots.
    if hidden_layers > 0:
        if hidden_layers <= unroll_limit:
            for l in range(hidden_layers):
                w = wh_ref[l]
                z = jnp.dot(h.astype(w.dtype), w,
                            preferred_element_type=jnp.float32) + bh_ref[l]
                h = jnp.sin(z)
        else:
            # Deep nets: bound vreg live ranges / code size with a real loop.
            def body(l, hc):
                w = wh_ref[l]
                z = jnp.dot(hc.astype(w.dtype), w,
                            preferred_element_type=jnp.float32) + bh_ref[l]
                return jnp.sin(z)
            h = lax.fori_loop(0, hidden_layers, body, h)

    # Final linear (no activation); output tile is G*OUT lanes wide (128 here).
    wf = wf_ref[...]
    y = jnp.dot(h.astype(wf.dtype), wf,
                preferred_element_type=jnp.float32) + bf_ref[...]
    out_ref[...] = y.astype(out_ref.dtype)


# ------------------------- one-time weight preparation ---------------------- #

def prepare_cknet_params(params, *, in_features, hidden_layers,
                         first_omega_0, hidden_omega_0,
                         matmul_dtype=jnp.float32):
    """Fold omega_0 into W/b and lane-pack the weights ONCE (not per forward call).

    With G = 128 // H row-groups packed along the lane axis, hidden/final weights
    become block-diagonal (G identical HxH / HxOUT blocks) and biases are tiled G
    times; the packing is algebraically exact (off-diagonal zeros contribute 0).
    """
    w1, b1, wh, bh, wf, bf = params
    F = in_features
    H = w1.shape[1]
    OUT = wf.shape[1]
    L = hidden_layers

    if H <= 128 and 128 % H == 0:
        G = 128 // H                  # lane-pack G rows per packed row
        Hp = 128
    else:
        G = 1                         # fallback: plain zero-padding to 128 multiple
        Hp = _round_up(H, 128)
    OUTp = G * OUT

    w1f = (first_omega_0 * w1).astype(jnp.float32)
    b1f = (first_omega_0 * b1).astype(jnp.float32).reshape(1, H)
    wff = wf.astype(jnp.float32)
    bff = bf.astype(jnp.float32).reshape(1, OUT)

    w1_p = jnp.zeros((G * F, Hp), jnp.float32)
    b1_p = jnp.zeros((1, Hp), jnp.float32)
    wf_p = jnp.zeros((Hp, OUTp), jnp.float32)
    bf_p = jnp.zeros((1, OUTp), jnp.float32)
    for g in range(G):
        w1_p = w1_p.at[g * F:(g + 1) * F, g * H:(g + 1) * H].set(w1f)
        b1_p = b1_p.at[:, g * H:(g + 1) * H].set(b1f)
        wf_p = wf_p.at[g * H:(g + 1) * H, g * OUT:(g + 1) * OUT].set(wff)
        bf_p = bf_p.at[:, g * OUT:(g + 1) * OUT].set(bff)

    if L > 0:
        whf = (hidden_omega_0 * wh).astype(jnp.float32)
        bhf = (hidden_omega_0 * bh).astype(jnp.float32).reshape(L, 1, H)
        wh_p = jnp.zeros((L, Hp, Hp), jnp.float32)
        bh_p = jnp.zeros((L, 1, Hp), jnp.float32)
        for g in range(G):
            wh_p = wh_p.at[:, g * H:(g + 1) * H, g * H:(g + 1) * H].set(whf)
            bh_p = bh_p.at[:, :, g * H:(g + 1) * H].set(bhf)
        wh_p = wh_p.astype(matmul_dtype)
    else:
        wh_p = bh_p = None            # hidden_layers == 0: no dummy block is DMA'd

    return dict(G=G, F=F, H=H, Hp=Hp, OUT=OUT, OUTp=OUTp, L=L,
                w1=w1_p.astype(matmul_dtype), b1=b1_p,
                wh=wh_p, bh=bh_p,
                wf=wf_p.astype(matmul_dtype), bf=bf_p)


# ------------------------------ forward wrapper ------------------------------ #

def cknet_linear_forward(coords, prepared, *, max_tn=512):
    """coords: (N, in_features) -> (N, in_channels*out_channels)."""
    G, F, Hp = prepared["G"], prepared["F"], prepared["Hp"]
    OUT, OUTp, L = prepared["OUT"], prepared["OUTp"], prepared["L"]

    N = coords.shape[0]
    assert coords.shape[1] == F
    rows = -(-N // G)                                   # packed rows

    if L > 0:
        weights = [prepared["w1"], prepared["b1"], prepared["wh"],
                   prepared["bh"], prepared["wf"], prepared["bf"]]
    else:
        weights = [prepared["w1"], prepared["b1"],
                   prepared["wf"], prepared["bf"]]
    weight_bytes = sum(int(w.size) * w.dtype.itemsize for w in weights)

    # Generation-aware VMEM budget (v7x: 64 MiB/core, v5e/v6e: 128 MiB).
    cap = _vmem_capacity_bytes()
    budget = int(0.75 * cap)

    def tile_bytes(tn_):
        io = 2 * 4 * tn_ * (G * F) + 2 * 4 * tn_ * OUTp   # double-buffered I/O blocks
        act = 4 * 4 * tn_ * Hp                            # in-kernel activation headroom
        return io + act

    # Single grid step whenever all packed rows fit one tile (small-N fast path);
    # large N tiles at up to max_tn rows and lets the grid/megacore handle the rest.
    tn = min(max_tn, max(8, _round_up(rows, 8)))
    while tn > 8 and 2 * weight_bytes + tile_bytes(tn) > budget:
        tn = max(8, _round_up(tn // 2, 8))

    rows_pad = _round_up(rows, tn)
    n_pad = rows_pad * G
    grid = (rows_pad // tn,)

    # Pack coordinates: (N,F) -> (rows_pad, G*F); padded rows are sliced off at the end.
    coords_p = jnp.zeros((n_pad, F), jnp.float32).at[:N].set(coords.astype(jnp.float32))
    coords_packed = coords_p.reshape(rows_pad, G * F)

    kernel = partial(cknet_kernel, hidden_layers=L)

    flops = 2 * rows_pad * (G * F * Hp + L * Hp * Hp + Hp * OUTp)
    transcendentals = rows_pad * Hp * (L + 1)
    bytes_accessed = 4 * rows_pad * (G * F + OUTp) + weight_bytes

    vmem_limit = min(int(0.8 * cap),
                     max(32 * 2**20, 2 * (2 * weight_bytes + tile_bytes(tn))))

    def _const_index_map(nd):
        def imap(i):
            return (0,) * nd
        return imap

    def _run(weight_mode):
        in_specs = [pl.BlockSpec((tn, G * F), lambda i: (i, 0))]
        inputs = [coords_packed]
        for w in weights:
            if weight_mode is None:
                spec = pl.BlockSpec(w.shape, _const_index_map(w.ndim))
            else:
                spec = pl.BlockSpec(w.shape, _const_index_map(w.ndim),
                                    pipeline_mode=weight_mode)
            in_specs.append(spec)
            inputs.append(w)
        return pl.pallas_call(
            kernel,
            out_shape=jax.ShapeDtypeStruct((rows_pad, OUTp), jnp.float32),
            grid=grid,
            in_specs=in_specs,
            out_specs=pl.BlockSpec((tn, OUTp), lambda i: (i, 0)),
            compiler_params=pltpu.CompilerParams(
                dimension_semantics=("parallel",),
                vmem_limit_bytes=int(vmem_limit)),
            cost_estimate=pl.CostEstimate(
                flops=int(flops),
                transcendentals=int(transcendentals),
                bytes_accessed=int(bytes_accessed)),
        )(*inputs)

    try:
        # Weights are constant across the grid -> request single buffering.
        out_packed = _run(pl.Buffered(1))
    except Exception:
        # TODO(synk): pipeline_mode=pl.Buffered(1) rejected by this jax version;
        # fall back to default double buffering (weights are small here anyway).
        out_packed = _run(None)

    # Unpack lanes back to rows: (rows_pad, G*OUT) -> (rows_pad*G, OUT); no column
    # padding remains, so only the (small) row padding is sliced off.
    out = out_packed.reshape(rows_pad * G, OUT)
    return out[:N]


# --------------------------- parameter init -------------------------------- #

def init_cknet_linear_params(key, *, in_features, in_channels, out_channels,
                             kernel_size, hidden_features, hidden_layers,
                             hidden_omega_0):
    """Deterministic SIREN + final_linear init matching the PyTorch module."""
    H = hidden_features
    OUT = in_channels * out_channels
    k = jax.random.split(key, 6)

    # First SIREN layer: W ~ U(-1/in_features, 1/in_features); bias = default Linear init.
    lim1 = 1.0 / in_features
    w1 = jax.random.uniform(k[0], (in_features, H), jnp.float32, -lim1, lim1)
    b1 = jax.random.uniform(k[1], (1, H), jnp.float32,
                            -1.0 / jnp.sqrt(in_features), 1.0 / jnp.sqrt(in_features))

    # Hidden SIREN layers: W ~ U(-sqrt(6/H)/omega, sqrt(6/H)/omega).
    limh = jnp.sqrt(6.0 / H) / hidden_omega_0
    wh = jax.random.uniform(k[2], (max(hidden_layers, 1), H, H), jnp.float32, -limh, limh)
    bh = jax.random.uniform(k[3], (max(hidden_layers, 1), 1, H), jnp.float32,
                            -1.0 / jnp.sqrt(H), 1.0 / jnp.sqrt(H))
    wh = wh[:hidden_layers]
    bh = bh[:hidden_layers]

    # final_linear: W ~ U(-sqrt(6/H)/sqrt(in_channels*ks^2), +), bias zero.
    fan_in = in_channels * kernel_size ** 2
    limf = (6.0 / H) ** 0.5 / (fan_in ** 0.5)
    wf = jax.random.uniform(k[4], (H, OUT), jnp.float32, -limf, limf)
    bf = jnp.zeros((1, OUT), jnp.float32)

    return (w1, b1, wh, bh, wf, bf)


def reference_forward(coords, params, *, hidden_layers, first_omega_0, hidden_omega_0):
    """Pure-JAX reference of the same forward pass (for correctness check)."""
    w1, b1, wh, bh, wf, bf = params
    h = jnp.sin(first_omega_0 * (coords @ w1 + b1))
    for l in range(hidden_layers):
        h = jnp.sin(hidden_omega_0 * (h @ wh[l] + bh[l]))
    return h @ wf + bf


# --------------------------------- main ------------------------------------ #

if __name__ == "__main__":
    # Small, module-consistent config.
    in_features = 2          # 2-D spatial kernel coordinates
    in_channels = 4
    out_channels = 8
    kernel_size = 3
    hidden_features = 32
    hidden_layers = 3
    first_omega_0 = 30.0
    hidden_omega_0 = 30.0

    key = jax.random.PRNGKey(0)
    pkey, ckey = jax.random.split(key)

    params = init_cknet_linear_params(
        pkey, in_features=in_features, in_channels=in_channels,
        out_channels=out_channels, kernel_size=kernel_size,
        hidden_features=hidden_features, hidden_layers=hidden_layers,
        hidden_omega_0=hidden_omega_0)

    # One-time weight preparation (omega folding + lane packing) — NOT per call.
    prepared = prepare_cknet_params(
        params, in_features=in_features, hidden_layers=hidden_layers,
        first_omega_0=first_omega_0, hidden_omega_0=hidden_omega_0)

    # Coordinate grid: kernel_size^2 coordinates in [-1, 1]^2 (deterministic).
    N = kernel_size ** 2
    coords = jax.random.uniform(ckey, (N, in_features), jnp.float32, -1.0, 1.0)

    out = cknet_linear_forward(coords, prepared)
    out = jax.block_until_ready(out)

    ref = reference_forward(coords, params,
                            hidden_layers=hidden_layers,
                            first_omega_0=first_omega_0,
                            hidden_omega_0=hidden_omega_0)
    assert out.shape == (N, in_channels * out_channels)
    assert jnp.allclose(out, ref, atol=1e-4, rtol=1e-4)

    print("KERNEL_OK")
</pallas_src>

<mosaic_0001>
module attributes {stable_mosaic.version = 11 : i64} {
  func.func @cknet_kernel(%arg0: i32, %arg1: memref<8x8xf32, #tpu.memory_space<vmem>>, %arg2: memref<8x128xf32, #tpu.memory_space<vmem>>, %arg3: memref<1x128xf32, #tpu.memory_space<vmem>>, %arg4: memref<3x128x128xf32, #tpu.memory_space<vmem>>, %arg5: memref<3x1x128xf32, #tpu.memory_space<vmem>>, %arg6: memref<128x128xf32, #tpu.memory_space<vmem>>, %arg7: memref<1x128xf32, #tpu.memory_space<vmem>>, %arg8: memref<8x128xf32, #tpu.memory_space<vmem>>) attributes {dimension_semantics = [#tpu.dimension_semantics<parallel>], iteration_bounds = array<i64: 1>, scalar_prefetch = 0 : i64, scratch_operands = 0 : i64, tpu.core_type = #tpu.core_type<tc>, window_params = [{transform_indices = @transform_0, window_bounds = array<i64: 8, 8>}, {pipeline_mode = #tpu.pipeline_mode<synchronous>, transform_indices = @transform_1, window_bounds = array<i64: 8, 128>}, {pipeline_mode = #tpu.pipeline_mode<synchronous>, transform_indices = @transform_2, window_bounds = array<i64: 1, 128>}, {pipeline_mode = #tpu.pipeline_mode<synchronous>, transform_indices = @transform_3, window_bounds = array<i64: 3, 128, 128>}, {pipeline_mode = #tpu.pipeline_mode<synchronous>, transform_indices = @transform_4, window_bounds = array<i64: 3, 1, 128>}, {pipeline_mode = #tpu.pipeline_mode<synchronous>, transform_indices = @transform_5, window_bounds = array<i64: 128, 128>}, {pipeline_mode = #tpu.pipeline_mode<synchronous>, transform_indices = @transform_6, window_bounds = array<i64: 1, 128>}, {transform_indices = @transform_7, window_bounds = array<i64: 8, 128>}]} {
    %c0 = arith.constant 0 : index
    %c0_0 = arith.constant 0 : index
    %0 = vector.load %arg1[%c0, %c0_0] : memref<8x8xf32, #tpu.memory_space<vmem>>, vector<8x8xf32>
    %c0_1 = arith.constant 0 : index
    %c0_2 = arith.constant 0 : index
    %1 = vector.load %arg2[%c0_1, %c0_2] : memref<8x128xf32, #tpu.memory_space<vmem>>, vector<8x128xf32>
    %cst = arith.constant dense<0.000000e+00> : vector<8x128xf32>
    %2 = tpu.matmul %0, %1, %cst {dimension_numbers = #tpu.dot_dimension_numbers<[1], [0], [0], [1], [0, 0, 1, 1], [], []>} : vector<8x8xf32>, vector<8x128xf32>, vector<8x128xf32> -> vector<8x128xf32>
    %c0_3 = arith.constant 0 : index
    %c0_4 = arith.constant 0 : index
    %3 = vector.load %arg3[%c0_3, %c0_4] : memref<1x128xf32, #tpu.memory_space<vmem>>, vector<1x128xf32>
    %4 = vector.broadcast %3 : vector<1x128xf32> to vector<8x128xf32>
    %5 = arith.addf %2, %4 : vector<8x128xf32>
    %6 = math.sin %5 : vector<8x128xf32>
    %c0_5 = arith.constant 0 : index
    %c0_6 = arith.constant 0 : index
    %c0_7 = arith.constant 0 : index
    %7 = vector.load %arg4[%c0_5, %c0_6, %c0_7] : memref<3x128x128xf32, #tpu.memory_space<vmem>>, vector<1x128x128xf32>
    %8 = vector.shape_cast %7 : vector<1x128x128xf32> to vector<128x128xf32>
    %cst_8 = arith.constant dense<0.000000e+00> : vector<8x128xf32>
    %9 = tpu.matmul %6, %8, %cst_8 {dimension_numbers = #tpu.dot_dimension_numbers<[1], [0], [0], [1], [0, 0, 1, 1], [], []>} : vector<8x128xf32>, vector<128x128xf32>, vector<8x128xf32> -> vector<8x128xf32>
    %c0_9 = arith.constant 0 : index
    %c0_10 = arith.constant 0 : index
    %c0_11 = arith.constant 0 : index
    %10 = vector.load %arg5[%c0_9, %c0_10, %c0_11] : memref<3x1x128xf32, #tpu.memory_space<vmem>>, vector<1x1x128xf32>
    %11 = vector.shape_cast %10 : vector<1x1x128xf32> to vector<1x128xf32>
    %12 = vector.broadcast %11 : vector<1x128xf32> to vector<8x128xf32>
    %13 = arith.addf %9, %12 : vector<8x128xf32>
    %14 = math.sin %13 : vector<8x128xf32>
    %c1 = arith.constant 1 : index
    %c0_12 = arith.constant 0 : index
    %c0_13 = arith.constant 0 : index
    %15 = vector.load %arg4[%c1, %c0_12, %c0_13] : memref<3x128x128xf32, #tpu.memory_space<vmem>>, vector<1x128x128xf32>
    %16 = vector.shape_cast %15 : vector<1x128x128xf32> to vector<128x128xf32>
    %cst_14 = arith.constant dense<0.000000e+00> : vector<8x128xf32>
    %17 = tpu.matmul %14, %16, %cst_14 {dimension_numbers = #tpu.dot_dimension_numbers<[1], [0], [0], [1], [0, 0, 1, 1], [], []>} : vector<8x128xf32>, vector<128x128xf32>, vector<8x128xf32> -> vector<8x128xf32>
    %c1_15 = arith.constant 1 : index
    %c0_16 = arith.constant 0 : index
    %c0_17 = arith.constant 0 : index
    %18 = vector.load %arg5[%c1_15, %c0_16, %c0_17] : memref<3x1x128xf32, #tpu.memory_space<vmem>>, vector<1x1x128xf32>
    %19 = vector.shape_cast %18 : vector<1x1x128xf32> to vector<1x128xf32>
    %20 = vector.broadcast %19 : vector<1x128xf32> to vector<8x128xf32>
    %21 = arith.addf %17, %20 : vector<8x128xf32>
    %22 = math.sin %21 : vector<8x128xf32>
    %c2 = arith.constant 2 : index
    %c0_18 = arith.constant 0 : index
    %c0_19 = arith.constant 0 : index
    %23 = vector.load %arg4[%c2, %c0_18, %c0_19] : memref<3x128x128xf32, #tpu.memory_space<vmem>>, vector<1x128x128xf32>
    %24 = vector.shape_cast %23 : vector<1x128x128xf32> to vector<128x128xf32>
    %cst_20 = arith.constant dense<0.000000e+00> : vector<8x128xf32>
    %25 = tpu.matmul %22, %24, %cst_20 {dimension_numbers = #tpu.dot_dimension_numbers<[1], [0], [0], [1], [0, 0, 1, 1], [], []>} : vector<8x128xf32>, vector<128x128xf32>, vector<8x128xf32> -> vector<8x128xf32>
    %c2_21 = arith.constant 2 : index
    %c0_22 = arith.constant 0 : index
    %c0_23 = arith.constant 0 : index
    %26 = vector.load %arg5[%c2_21, %c0_22, %c0_23] : memref<3x1x128xf32, #tpu.memory_space<vmem>>, vector<1x1x128xf32>
    %27 = vector.shape_cast %26 : vector<1x1x128xf32> to vector<1x128xf32>
    %28 = vector.broadcast %27 : vector<1x128xf32> to vector<8x128xf32>
    %29 = arith.addf %25, %28 : vector<8x128xf32>
    %30 = math.sin %29 : vector<8x128xf32>
    %c0_24 = arith.constant 0 : index
    %c0_25 = arith.constant 0 : index
    %31 = vector.load %arg6[%c0_24, %c0_25] : memref<128x128xf32, #tpu.memory_space<vmem>>, vector<128x128xf32>
    %cst_26 = arith.constant dense<0.000000e+00> : vector<8x128xf32>
    %32 = tpu.matmul %30, %31, %cst_26 {dimension_numbers = #tpu.dot_dimension_numbers<[1], [0], [0], [1], [0, 0, 1, 1], [], []>} : vector<8x128xf32>, vector<128x128xf32>, vector<8x128xf32> -> vector<8x128xf32>
    %c0_27 = arith.constant 0 : index
    %c0_28 = arith.constant 0 : index
    %33 = vector.load %arg7[%c0_27, %c0_28] : memref<1x128xf32, #tpu.memory_space<vmem>>, vector<1x128xf32>
    %34 = vector.broadcast %33 : vector<1x128xf32> to vector<8x128xf32>
    %35 = arith.addf %32, %34 : vector<8x128xf32>
    %c0_29 = arith.constant 0 : index
    %c0_30 = arith.constant 0 : index
    %36 = vector.load %arg8[%c0_29, %c0_30] : memref<8x128xf32, #tpu.memory_space<vmem>>, vector<8x128xf32>
    tpu.vector_store %arg8[%c0_29, %c0_30], %35 {strides = array<i32>} : memref<8x128xf32, #tpu.memory_space<vmem>>, vector<8x128xf32>,
    return
  }
  func.func @transform_0(%arg0: i32) -> (i32, i32) {
    %c0_i32 = arith.constant 0 : i32
    %c0_i32_0 = arith.constant 0 : i32
    return %arg0, %c0_i32 : i32, i32
  }
  func.func @transform_1(%arg0: i32) -> (i32, i32) {
    %c0_i32 = arith.constant 0 : i32
    %c0_i32_0 = arith.constant 0 : i32
    %c0_i32_1 = arith.constant 0 : i32
    return %c0_i32, %c0_i32_0 : i32, i32
  }
  func.func @transform_2(%arg0: i32) -> (i32, i32) {
    %c0_i32 = arith.constant 0 : i32
    %c0_i32_0 = arith.constant 0 : i32
    %c0_i32_1 = arith.constant 0 : i32
    return %c0_i32, %c0_i32_0 : i32, i32
  }
  func.func @transform_3(%arg0: i32) -> (i32, i32, i32) {
    %c0_i32 = arith.constant 0 : i32
    %c0_i32_0 = arith.constant 0 : i32
    %c0_i32_1 = arith.constant 0 : i32
    %c0_i32_2 = arith.constant 0 : i32
    return %c0_i32, %c0_i32_0, %c0_i32_1 : i32, i32, i32
  }
  func.func @transform_4(%arg0: i32) -> (i32, i32, i32) {
    %c0_i32 = arith.constant 0 : i32
    %c0_i32_0 = arith.constant 0 : i32
    %c0_i32_1 = arith.constant 0 : i32
    %c0_i32_2 = arith.constant 0 : i32
    return %c0_i32, %c0_i32_0, %c0_i32_1 : i32, i32, i32
  }
  func.func @transform_5(%arg0: i32) -> (i32, i32) {
    %c0_i32 = arith.constant 0 : i32
    %c0_i32_0 = arith.constant 0 : i32
    %c0_i32_1 = arith.constant 0 : i32
    return %c0_i32, %c0_i32_0 : i32, i32
  }
  func.func @transform_6(%arg0: i32) -> (i32, i32) {
    %c0_i32 = arith.constant 0 : i32
    %c0_i32_0 = arith.constant 0 : i32
    %c0_i32_1 = arith.constant 0 : i32
    return %c0_i32, %c0_i32_0 : i32, i32
  }
  func.func @transform_7(%arg0: i32) -> (i32, i32) {
    %c0_i32 = arith.constant 0 : i32
    %c0_i32_0 = arith.constant 0 : i32
    return %arg0, %c0_i32 : i32, i32
  }
}

module attributes {stable_mosaic.version = 11 : i64} {
  func.func @cknet_kernel(%arg0: i32, %arg1: memref<8x8xf32, #tpu.memory_space<vmem>>, %arg2: memref<8x128xf32, #tpu.memory_space<vmem>>, %arg3: memref<1x128xf32, #tpu.memory_space<vmem>>, %arg4: memref<3x128x128xf32, #tpu.memory_space<vmem>>, %arg5: memref<3x1x128xf32, #tpu.memory_space<vmem>>, %arg6: memref<128x128xf32, #tpu.memory_space<vmem>>, %arg7: memref<1x128xf32, #tpu.memory_space<vmem>>, %arg8: memref<8x128xf32, #tpu.memory_space<vmem>>) attributes {dimension_semantics = [#tpu.dimension_semantics<parallel>], iteration_bounds = array<i64: 1>, scalar_prefetch = 0 : i64, scratch_operands = 0 : i64, tpu.core_type = #tpu.core_type<tc>, window_params = [{transform_indices = @transform_0, window_bounds = array<i64: 8, 8>}, {pipeline_mode = #tpu.pipeline_mode<synchronous>, transform_indices = @transform_1, window_bounds = array<i64: 8, 128>}, {pipeline_mode = #tpu.pipeline_mode<synchronous>, transform_indices = @transform_2, window_bounds = array<i64: 1, 128>}, {pipeline_mode = #tpu.pipeline_mode<synchronous>, transform_indices = @transform_3, window_bounds = array<i64: 3, 128, 128>}, {pipeline_mode = #tpu.pipeline_mode<synchronous>, transform_indices = @transform_4, window_bounds = array<i64: 3, 1, 128>}, {pipeline_mode = #tpu.pipeline_mode<synchronous>, transform_indices = @transform_5, window_bounds = array<i64: 128, 128>}, {pipeline_mode = #tpu.pipeline_mode<synchronous>, transform_indices = @transform_6, window_bounds = array<i64: 1, 128>}, {transform_indices = @transform_7, window_bounds = array<i64: 8, 128>}]} {
    %c0 = arith.constant 0 : index
    %c0_0 = arith.constant 0 : index
    %0 = vector.load %arg1[%c0, %c0_0] : memref<8x8xf32, #tpu.memory_space<vmem>>, vector<8x8xf32>
    %c0_1 = arith.constant 0 : index
    %c0_2 = arith.constant 0 : index
    %1 = vector.load %arg2[%c0_1, %c0_2] : memref<8x128xf32, #tpu.memory_space<vmem>>, vector<8x128xf32>
    %cst = arith.constant dense<0.000000e+00> : vector<8x128xf32>
    %2 = tpu.matmul %0, %1, %cst {dimension_numbers = #tpu.dot_dimension_numbers<[1], [0], [0], [1], [0, 0, 1, 1], [], []>} : vector<8x8xf32>, vector<8x128xf32>, vector<8x128xf32> -> vector<8x128xf32>
    %c0_3 = arith.constant 0 : index
    %c0_4 = arith.constant 0 : index
    %3 = vector.load %arg3[%c0_3, %c0_4] : memref<1x128xf32, #tpu.memory_space<vmem>>, vector<1x128xf32>
    %4 = vector.broadcast %3 : vector<1x128xf32> to vector<8x128xf32>
    %5 = arith.addf %2, %4 : vector<8x128xf32>
    %6 = math.sin %5 : vector<8x128xf32>
    %c0_5 = arith.constant 0 : index
    %c0_6 = arith.constant 0 : index
    %c0_7 = arith.constant 0 : index
    %7 = vector.load %arg4[%c0_5, %c0_6, %c0_7] : memref<3x128x128xf32, #tpu.memory_space<vmem>>, vector<1x128x128xf32>
    %8 = vector.shape_cast %7 : vector<1x128x128xf32> to vector<128x128xf32>
    %cst_8 = arith.constant dense<0.000000e+00> : vector<8x128xf32>
    %9 = tpu.matmul %6, %8, %cst_8 {dimension_numbers = #tpu.dot_dimension_numbers<[1], [0], [0], [1], [0, 0, 1, 1], [], []>} : vector<8x128xf32>, vector<128x128xf32>, vector<8x128xf32> -> vector<8x128xf32>
    %c0_9 = arith.constant 0 : index
    %c0_10 = arith.constant 0 : index
    %c0_11 = arith.constant 0 : index
    %10 = vector.load %arg5[%c0_9, %c0_10, %c0_11] : memref<3x1x128xf32, #tpu.memory_space<vmem>>, vector<1x1x128xf32>
    %11 = vector.shape_cast %10 : vector<1x1x128xf32> to vector<1x128xf32>
    %12 = vector.broadcast %11 : vector<1x128xf32> to vector<8x128xf32>
    %13 = arith.addf %9, %12 : vector<8x128xf32>
    %14 = math.sin %13 : vector<8x128xf32>
    %c1 = arith.constant 1 : index
    %c0_12 = arith.constant 0 : index
    %c0_13 = arith.constant 0 : index
    %15 = vector.load %arg4[%c1, %c0_12, %c0_13] : memref<3x128x128xf32, #tpu.memory_space<vmem>>, vector<1x128x128xf32>
    %16 = vector.shape_cast %15 : vector<1x128x128xf32> to vector<128x128xf32>
    %cst_14 = arith.constant dense<0.000000e+00> : vector<8x128xf32>
    %17 = tpu.matmul %14, %16, %cst_14 {dimension_numbers = #tpu.dot_dimension_numbers<[1], [0], [0], [1], [0, 0, 1, 1], [], []>} : vector<8x128xf32>, vector<128x128xf32>, vector<8x128xf32> -> vector<8x128xf32>
    %c1_15 = arith.constant 1 : index
    %c0_16 = arith.constant 0 : index
    %c0_17 = arith.constant 0 : index
    %18 = vector.load %arg5[%c1_15, %c0_16, %c0_17] : memref<3x1x128xf32, #tpu.memory_space<vmem>>, vector<1x1x128xf32>
    %19 = vector.shape_cast %18 : vector<1x1x128xf32> to vector<1x128xf32>
    %20 = vector.broadcast %19 : vector<1x128xf32> to vector<8x128xf32>
    %21 = arith.addf %17, %20 : vector<8x128xf32>
    %22 = math.sin %21 : vector<8x128xf32>
    %c2 = arith.constant 2 : index
    %c0_18 = arith.constant 0 : index
    %c0_19 = arith.constant 0 : index
    %23 = vector.load %arg4[%c2, %c0_18, %c0_19] : memref<3x128x128xf32, #tpu.memory_space<vmem>>, vector<1x128x128xf32>
    %24 = vector.shape_cast %23 : vector<1x128x128xf32> to vector<128x128xf32>
    %cst_20 = arith.constant dense<0.000000e+00> : vector<8x128xf32>
    %25 = tpu.matmul %22, %24, %cst_20 {dimension_numbers = #tpu.dot_dimension_numbers<[1], [0], [0], [1], [0, 0, 1, 1], [], []>} : vector<8x128xf32>, vector<128x128xf32>, vector<8x128xf32> -> vector<8x128xf32>
    %c2_21 = arith.constant 2 : index
    %c0_22 = arith.constant 0 : index
    %c0_23 = arith.constant 0 : index
    %26 = vector.load %arg5[%c2_21, %c0_22, %c0_23] : memref<3x1x128xf32, #tpu.memory_space<vmem>>, vector<1x1x128xf32>
    %27 = vector.shape_cast %26 : vector<1x1x128xf32> to vector<1x128xf32>
    %28 = vector.broadcast %27 : vector<1x128xf32> to vector<8x128xf32>
    %29 = arith.addf %25, %28 : vector<8x128xf32>
    %30 = math.sin %29 : vector<8x128xf32>
    %c0_24 = arith.constant 0 : index
    %c0_25 = arith.constant 0 : index
    %31 = vector.load %arg6[%c0_24, %c0_25] : memref<128x128xf32, #tpu.memory_space<vmem>>, vector<128x128xf32>
    %cst_26 = arith.constant dense<0.000000e+00> : vector<8x128xf32>
    %32 = tpu.matmul %30, %31, %cst_26 {dimension_numbers = #tpu.dot_dimension_numbers<[1], [0], [0], [1], [0, 0, 1, 1], [], []>} : vector<8x128xf32>, vector<128x128xf32>, vector<8x128xf32> -> vector<8x128xf32>
    %c0_27 = arith.constant 0 : index
    %c0_28 = arith.constant 0 : index
    %33 = vector.load %arg7[%c0_27, %c0_28] : memref<1x128xf32, #tpu.memory_space<vmem>>, vector<1x128xf32>
    %34 = vector.broadcast %33 : vector<1x128xf32> to vector<8x128xf32>
    %35 = arith.addf %32, %34 : vector<8x128xf32>
    %c0_29 = arith.constant 0 : index
    %c0_30 = arith.constant 0 : index
    %36 = vector.load %arg8[%c0_29, %c0_30] : memref<8x128xf32, #tpu.memory_space<vmem>>, vector<8x128xf32>
    tpu.vector_store %arg8[%c0_29, %c0_30], %35 {strides = array<i32>} : memref<8x128xf32, #tpu.memory_space<vmem>>, vector<8x128xf32>,
    return
  }
  func.func @transform_0(%arg0: i32) -> (i32, i32) {
    %c0_i32 = arith.constant 0 : i32
    %c0_i32_0 = arith.constant 0 : i32
    return %arg0, %c0_i32 : i32, i32
  }
  func.func @transform_1(%arg0: i32) -> (i32, i32) {
    %c0_i32 = arith.constant 0 : i32
    %c0_i32_0 = arith.constant 0 : i32
    %c0_i32_1 = arith.constant 0 : i32
    return %c0_i32, %c0_i32_0 : i32, i32
  }
  func.func @transform_2(%arg0: i32) -> (i32, i32) {
    %c0_i32 = arith.constant 0 : i32
    %c0_i32_0 = arith.constant 0 : i32
    %c0_i32_1 = arith.constant 0 : i32
    return %c0_i32, %c0_i32_0 : i32, i32
  }
  func.func @transform_3(%arg0: i32) -> (i32, i32, i32) {
    %c0_i32 = arith.constant 0 : i32
    %c0_i32_0 = arith.constant 0 : i32
    %c0_i32_1 = arith.constant 0 : i32
    %c0_i32_2 = arith.constant 0 : i32
    return %c0_i32, %c0_i32_0, %c0_i32_1 : i32, i32, i32
  }
  func.func @transform_4(%arg0: i32) -> (i32, i32, i32) {
    %c0_i32 = arith.constant 0 : i32
    %c0_i32_0 = arith.constant 0 : i32
    %c0_i32_1 = arith.constant 0 : i32
    %c0_i32_2 = arith.constant 0 : i32
    return %c0_i32, %c0_i32_0, %c0_i32_1 : i32, i32, i32
  }
  func.func @transform_5(%arg0: i32) -> (i32, i32) {
    %c0_i32 = arith.constant 0 : i32
    %c0_i32_0 = arith.constant 0 : i32
    %c0_i32_1 = arith.constant 0 : i32
    return %c0_i32, %c0_i32_0 : i32, i32
  }
  func.func @transform_6(%arg0: i32) -> (i32, i32) {
    %c0_i32 = arith.constant 0 : i32
    %c0_i32_0 = arith.constant 0 : i32
    %c0_i32_1 = arith.constant 0 : i32
    return %c0_i32, %c0_i32_0 : i32, i32
  }
  func.func @transform_7(%arg0: i32) -> (i32, i32) {
    %c0_i32 = arith.constant 0 : i32
    %c0_i32_0 = arith.constant 0 : i32
    return %arg0, %c0_i32 : i32, i32
  }
}

</mosaic_0001>

<bundles_post_ra>
// kernel: tpu_custom_call.1
= control target key start
LH: loop header
LB: loop body
LE: loop exit
PB: predicated region body
PF: predicated region fallthrough
CT: control target
= control target key end

     0   :  { %12 = vsyncpa [#allocation3], 0  ;;  %s1774_s0 = inlined_call_operand.hbm [shape: f32[8,8], index: 0, kind: input, shape index: {}]   ;;  %s1775_s1 = inlined_call_operand.hbm [shape: f32[8,128], index: 1, kind: input, shape index: {}]   ;;  %s1776_s2 = inlined_call_operand.vmem [shape: f32[1,128], index: 2, kind: input, shape index: {}]   ;;  %s1777_s3 = inlined_call_operand.hbm [shape: f32[3,128,128], index: 3, kind: input, shape index: {}]   ;;  %s1778_s4 = inlined_call_operand.vmem [shape: f32[3,1,128], index: 4, kind: input, shape index: {}]   ;;  %s1779_s5 = inlined_call_operand.hbm [shape: f32[128,128], index: 5, kind: input, shape index: {}]   ;;  %s1780_s6 = inlined_call_operand.vmem [shape: f32[1,128], index: 6, kind: input, shape index: {}]   ;;  %s1781_s7 = inlined_call_operand.hbm [shape: f32[8,128], index: 7, kind: output, shape index: {}]  }
   0x1   :  { %13 = vsyncpa [#allocation6], 0 }
   0x2   :  { %14 = vsyncpa [#allocation9], 0 }
   0x3   :  { %15 = vsyncpa [#allocation4], 0  ;;  %s1472_s24 = smov [#allocation5]   ;;  %s1473_s26 = smov [#allocation2]  }
   0x4   :  { %s32_s25 = sshll.u32 %s1472_s24, 4  ;;  %s22_s27 = sshll.u32 %s1473_s26, 4  ;;  %s33_s25 = int_to_ptr.vmem [resolvable:$true] %s32_s25  ;;  %s23_s27 = int_to_ptr.vmem [resolvable:$true] %s22_s27 }
   0x5   :  { %s1354_s30 = scalar_lea.hbm %s1775_s1, 128 }
   0x6   :  { %p1355_p0 = scmp.ne.s32.totalorder %s1775_s1, %s1354_s30  ;;  %p1358_p1 = scmp.lt.u32.totalorder %s1354_s30, %s1775_s1 }
   0x8   :  { %p1360_p2 = pnand %p1358_p1, %p1355_p0 }
   0xa   :  { %1363 = shalt.err (!%p1360_p2)
}
   0xb   :  { %s1364_s12 = scalar_lea.vmem %s33_s25, 128  ;;  %p1369_p4 = scmp.lt.s32.totalorder %s33_s25, %s33_s25 }
   0xc   :  { %p1365_p3 = scmp.ne.s32.totalorder %s33_s25, %s1364_s12  ;;  %p1370_p5 = scmp.lt.s32.totalorder %s1364_s12, %s1364_s12 }
   0xe   :  { %p1371_p6 = por %p1370_p5, %p1369_p4 }
  0x10   :  { %p1372_p7 = pnand %p1371_p6, %p1365_p3 }
  0x12   :  { %1375 = shalt.err (!%p1372_p7)
}
  0x13   :  { %35 = dma.hbm_to_vmem [thread:$0]  %s1775_s1, 128, %s33_s25, [#allocation6]  }
  0x14   :  { %s1376_s17 = scalar_lea.hbm %s1774_s0, 128 }
  0x15   :  { %p1377_p8 = scmp.ne.s32.totalorder %s1774_s0, %s1376_s17  ;;  %p1380_p9 = scmp.lt.u32.totalorder %s1376_s17, %s1774_s0 }
  0x17   :  { %p1382_p10 = pnand %p1380_p9, %p1377_p8 }
  0x19   :  { %1385 = shalt.err (!%p1382_p10)
}
  0x1a   :  { %s1386_s22 = scalar_lea.vmem %s23_s27, 128  ;;  %p1391_p12 = scmp.lt.s32.totalorder %s23_s27, %s23_s27 }
  0x1b   :  { %p1387_p11 = scmp.ne.s32.totalorder %s23_s27, %s1386_s22  ;;  %p1392_p13 = scmp.lt.s32.totalorder %s1386_s22, %s1386_s22 }
  0x1d   :  { %p1393_p0 = por %p1392_p13, %p1391_p12 }
  0x1f   :  { %p1394_p1 = pnand %p1393_p0, %p1387_p11 }
  0x21   :  { %1397 = shalt.err (!%p1394_p1)
}
  0x22   :  { %25 = dma.hbm_to_vmem [thread:$0]  %s1774_s0, 128, %s23_s27, [#allocation3]  }
  0x23   :  { %s1474_s24 = smov [#allocation7]   ;;  %s1398_s29 = scalar_lea.hbm %s1777_s3, 6144 }
  0x24   :  { %s43_s25 = sshll.u32 %s1474_s24, 4  ;;  %p1399_p2 = scmp.ne.s32.totalorder %s1777_s3, %s1398_s29  ;;  %s44_s25 = int_to_ptr.vmem [resolvable:$true] %s43_s25 }
  0x25   :  { %p1402_p3 = scmp.lt.u32.totalorder %s1398_s29, %s1777_s3 }
  0x27   :  { %p1404_p4 = pnand %p1402_p3, %p1399_p2 }
  0x29   :  { %1407 = shalt.err (!%p1404_p4)
}
  0x2a   :  { %s1408_s11 = scalar_lea.vmem %s44_s25, 6144  ;;  %p1413_p6 = scmp.lt.s32.totalorder %s44_s25, %s44_s25 }
  0x2b   :  { %p1409_p5 = scmp.ne.s32.totalorder %s44_s25, %s1408_s11  ;;  %p1414_p7 = scmp.lt.s32.totalorder %s1408_s11, %s1408_s11 }
  0x2d   :  { %p1415_p8 = por %p1414_p7, %p1413_p6 }
  0x2f   :  { %p1416_p9 = pnand %p1415_p8, %p1409_p5 }
  0x31   :  { %1419 = shalt.err (!%p1416_p9)
}
  0x32   :  { %s1475_s0 = smov 128   ;;  %s1476_s27 = smov 8  }
  0x33   :  { %49 = dma.hbm_to_vmem [thread:$0]  %s1777_s3, 6144, %s44_s25, [#allocation6], %s1475_s0, %s1475_s0, %s1476_s27  }
  0x34   :  { %s1477_s14 = smov [#allocation8]   ;;  %s1420_s18 = scalar_lea.hbm %s1779_s5, 2048 }
  0x35   :  { %s57_s15 = sshll.u32 %s1477_s14, 4  ;;  %p1421_p10 = scmp.ne.s32.totalorder %s1779_s5, %s1420_s18  ;;  %s58_s15 = int_to_ptr.vmem [resolvable:$true] %s57_s15 }
  0x36   :  { %p1424_p11 = scmp.lt.u32.totalorder %s1420_s18, %s1779_s5 }
  0x38   :  { %p1426_p12 = pnand %p1424_p11, %p1421_p10 }
  0x3a   :  { %1429 = shalt.err (!%p1426_p12)
}
  0x3b   :  { %s1430_s1 = scalar_lea.vmem %s58_s15, 2048  ;;  %p1435_p0 = scmp.lt.s32.totalorder %s58_s15, %s58_s15 }
  0x3c   :  { %p1431_p13 = scmp.ne.s32.totalorder %s58_s15, %s1430_s1  ;;  %p1436_p1 = scmp.lt.s32.totalorder %s1430_s1, %s1430_s1 }
  0x3e   :  { %p1437_p2 = por %p1436_p1, %p1435_p0 }
  0x40   :  { %p1438_p3 = pnand %p1437_p2, %p1431_p13 }
  0x42   :  { %1441 = shalt.err (!%p1438_p3)
}
  0x43   :  { %63 = dma.hbm_to_vmem [thread:$0]  %s1779_s5, 2048, %s58_s15, [#allocation9], %s1475_s0, %s1475_s0, %s1476_s27  }
  0x44   :  { %1464 = dma.done.wait [#allocation3], 128  }
  0x45   :  { %1465 = vsyncadd [#allocation3], 4294967168 }
  0x46   :  { %1466 = dma.done.wait [#allocation6], 6272  }
  0x47   :  { %1467 = vsyncadd [#allocation6], 4294961024 }
  0x48   :  { %1468 = dma.done.wait [#allocation9], 2048  }
  0x49   :  { %1469 = vsyncadd [#allocation9], 4294965248  ;;  %v1478_v0 = vmov 0.0   ;;  %vm1479_vm0 = vmmov 0   ;;  %vm87_vm1 = vcmask 64512   ;;  %v79_v1 = vld [vmem:[#allocation5] sm:$0xff] }
  0x4a   :  { %1065 = vmatprep.subr.mxu0 %v1478_v0  ;;  %1067 = vmatprep.mubr.msk.f32.mxu0 %vm1479_vm0, %v1478_v0  ;;  %v78_v2 = vld [vmem:[#allocation2] sm:$0xff]  ;;  %v265_v3 = vld [vmem:[#allocation7] sm:$0xff]  ;;  %v266_v4 = vld [vmem:[#allocation7 + $0x8] sm:$0xff]  ;;  %v1480_v6 = vmov 0.0|0.0   ;;  %v1481_v42 = vmov 683565275  }
  0x4b   :  { %1102 = vmatprep.mubr.msk.f32.mxu1 %vm1479_vm0, %v1478_v0  ;;  %1066 = vmatpush3.msra.mxu0 %v79_v1  ;;  %v1211_v5 = vpack.c.bf16 %v266_v4, %v265_v3  ;;  %v267_v7 = vld [vmem:[#allocation7 + $0x10] sm:$0xff]  ;;  %v268_v8 = vld [vmem:[#allocation7 + $0x18] sm:$0xff]  ;;  %v269_v10 = vld [vmem:[#allocation7 + $0x20] sm:$0xff]  ;;  %v1482_v44 = vmov 2475754826   ;;  %s1487_s9 = smov [#allocation10]  }
  0x4c   :  { %1068 = vmatmul.mubr.msk.f32.vlgmr.msra.gmra.mrb[0].mxu0 %vm87_vm1, %v78_v2  ;;  %1210 = vmatprep.subr.bf16.mxu1 %v1480_v6  ;;  %v1214_v9 = vpack.c.bf16 %v268_v8, %v267_v7  ;;  %v270_v11 = vld [vmem:[#allocation7 + $0x28] sm:$0xff]  ;;  %v271_v13 = vld [vmem:[#allocation7 + $0x30] sm:$0xff]  ;;  %v272_v14 = vld [vmem:[#allocation7 + $0x38] sm:$0xff]  ;;  %v1483_v47 = vmov 2131351028   ;;  %s960_s10 = sshll.u32 %s1487_s9, 4  ;;  %s961_s10 = int_to_ptr.vmem [resolvable:$true] %s960_s10 }
  0x4d   :  { %1137 = vmatprep.mubr.msk.f32.mxu0 %vm1479_vm0, %v1478_v0  ;;  %1234 = vmatprep.subr.bf16.mxu0 %v1480_v6  ;;  %v1217_v12 = vpack.c.bf16 %v270_v11, %v269_v10  ;;  %v1220_v15 = vpack.c.bf16 %v272_v14, %v271_v13  ;;  %v273_v16 = vld [vmem:[#allocation7 + $0x40] sm:$0xff]  ;;  %v274_v17 = vld [vmem:[#allocation7 + $0x48] sm:$0xff]  ;;  %v275_v19 = vld [vmem:[#allocation7 + $0x50] sm:$0xff]  ;;  %v1484_v50 = vmov 2102212464   ;;  %s1442_s11 = scalar_lea.vmem %s961_s10, 128  ;;  %p1447_p5 = scmp.lt.s32.totalorder %s961_s10, %s961_s10 }
  0x4e   :  { %1212 = vmatpush3.bf16.msra.mxu1 %v1211_v5  ;;  %v1223_v18 = vpack.c.bf16 %v274_v17, %v273_v16  ;;  %v276_v20 = vld [vmem:[#allocation7 + $0x58] sm:$0xff]  ;;  %v277_v22 = vld [vmem:[#allocation7 + $0x60] sm:$0xff]  ;;  %v278_v23 = vld [vmem:[#allocation7 + $0x68] sm:$0xff]  ;;  %v1485_v53 = vmov 920167782   ;;  %p1443_p4 = scmp.ne.s32.totalorder %s961_s10, %s1442_s11  ;;  %p1448_p6 = scmp.lt.s32.totalorder %s1442_s11, %s1442_s11 }
  0x4f   :  { %1213 = vmatprep.subr.bf16.mxu1 %v1480_v6  ;;  %v1226_v21 = vpack.c.bf16 %v276_v20, %v275_v19  ;;  %v1229_v24 = vpack.c.bf16 %v278_v23, %v277_v22  ;;  %v279_v25 = vld [vmem:[#allocation7 + $0x70] sm:$0xff]  ;;  %v280_v26 = vld [vmem:[#allocation7 + $0x78] sm:$0xff]  ;;  %v1486_v56 = vmov 1326507024  }
  0x50   :  { %v1232_v27 = vpack.c.bf16 %v280_v26, %v279_v25  ;;  %v971_v28 = vld [vmem:[%s1776_s2] ss:$0 sm:$0xff]  ;;  %p1449_p7 = por %p1448_p6, %p1447_p5 }
  0x52   :  { %1215 = vmatpush3.bf16.msra.mxu1 %v1214_v9  ;;  %p1450_p8 = pnand %p1449_p7, %p1443_p4 }
  0x53   :  { %1216 = vmatprep.subr.bf16.mxu1 %v1480_v6 }
  0x56   :  { %1218 = vmatpush3.bf16.msra.mxu1 %v1217_v12 }
  0x57   :  { %1219 = vmatprep.subr.bf16.mxu1 %v1480_v6 }
  0x5a   :  { %1221 = vmatpush3.bf16.msra.mxu1 %v1220_v15 }
  0x5b   :  { %1222 = vmatprep.subr.bf16.mxu1 %v1480_v6 }
  0x5e   :  { %1224 = vmatpush3.bf16.msra.mxu1 %v1223_v18 }
  0x5f   :  { %1225 = vmatprep.subr.bf16.mxu1 %v1480_v6 }
  0x62   :  { %1227 = vmatpush3.bf16.msra.mxu1 %v1226_v21 }
  0x63   :  { %1228 = vmatprep.subr.bf16.mxu1 %v1480_v6 }
  0x66   :  { %1230 = vmatpush3.bf16.msra.mxu1 %v1229_v24 }
  0x67   :  { %1231 = vmatprep.subr.bf16.mxu1 %v1480_v6 }
  0x6a   :  { %1233 = vmatpush3.bf16.msra.mxu1 %v1232_v27 }
  0x6b   :  { %1258 = vmatprep.subr.bf16.mxu1 %v1480_v6 }
 0x11f   :  { %v157_v29 = vpop.f32.mrb[0].mxu0 }
 0x120   :  { %v1596_v30 = vadd.f32 %v971_v28, %v157_v29  ;;  %v1069_v31 = vpop.f32.mrb[1].mxu0 }
 0x122   :  { %v164_v32 = vand.u32 2139095040, %v1596_v30  ;;  %v161_v36 = vand.u32 2147483647, %v1596_v30  ;;  %vm163_vm9 = vcmp.lt.s32.totalorder %v1596_v30, 0  ;;  %vm253_vm14 = vweird.f32 %v1596_v30 }
 0x124   :  { %v165_v33 = vshrl.u32 %v164_v32, 23  ;;  %v168_v39 = vand.u32 8388607, %v161_v36  ;;  %vm162_vm10 = vcmp.le.f32.partialorder %v161_v36, 0.7853982 }
 0x126   :  { %v973_v34 = vadd.s32 4294967169, %v165_v33  ;;  %v169_v58 = vor.u32 8388608, %v168_v39 }
 0x128   :  { %v171_v35 = vadd.s32 1, %v973_v34  ;;  %v209_v10 = vshll.u32 %v169_v58, 8 }
 0x12a   :  { %vm172_vm2 = vcmp.gt.s32.totalorder %v171_v35, 0 }
 0x12b   :  { %v173_v37 = vsel %vm172_vm2, %v171_v35, 0 }
 0x12c   :  { %v175_v38 = vand.u32 31, %v173_v37  ;;  %v174_v41 = vshrl.u32 %v173_v37, 5 }
 0x12e   :  { %v176_v40 = vsub.s32 32, %v175_v38  ;;  %v178_v43 = vshll.u32 %v1481_v42, %v175_v38  ;;  %v181_v45 = vshll.u32 %v1482_v44, %v175_v38  ;;  %v184_v49 = vshll.u32 %v1483_v47, %v175_v38 }
 0x12f   :  { %v187_v52 = vshll.u32 %v1484_v50, %v175_v38  ;;  %v190_v55 = vshll.u32 %v1485_v53, %v175_v38  ;;  %vm193_vm3 = vcmp.lt.s32.totalorder %v174_v41, 1  ;;  %vm196_vm4 = vcmp.lt.s32.totalorder %v174_v41, 4 }
 0x130   :  { %v179_v46 = vshrl.u32 %v1482_v44, %v176_v40  ;;  %v182_v48 = vshrl.u32 %v1483_v47, %v176_v40  ;;  %v185_v51 = vshrl.u32 %v1484_v50, %v176_v40  ;;  %v188_v54 = vshrl.u32 %v1485_v53, %v176_v40 }
 0x131   :  { %v191_v57 = vshrl.u32 %v1486_v56, %v176_v40  ;;  %v177_v4 = vshrl.u32 %v1481_v42, %v176_v40  ;;  %vm195_vm5 = vcmp.lt.s32.totalorder %v174_v41, 3  ;;  %vm194_vm6 = vcmp.lt.s32.totalorder %v174_v41, 2 }
 0x132   :  { %v180_v59 = vor.u32 %v179_v46, %v178_v43  ;;  %v183_v60 = vor.u32 %v182_v48, %v181_v45  ;;  %v186_v61 = vor.u32 %v185_v51, %v184_v49  ;;  %v189_v62 = vor.u32 %v188_v54, %v187_v52 }
 0x133   :  { %v192_v63 = vor.u32 %v191_v57, %v190_v55 }
 0x134   :  { %v198_v1 = vsel %vm196_vm4, %v186_v61, 2102212464  ;;  %v201_v2 = vsel %vm193_vm3, %v180_v59, %v183_v60  ;;  %v205_v3 = vsel %vm193_vm3, %v183_v60, %v186_v61  ;;  %v202_v5 = vsel %vm196_vm4, %v189_v62, 920167782 }
 0x135   :  { %v206_v7 = vsel %vm196_vm4, %v192_v63, 1326507024  ;;  %v203_v8 = vsel %vm195_vm5, %v186_v61, %v202_v5  ;;  %v197_v11 = vsel %vm193_vm3, %v177_v4, %v180_v59  ;;  %v199_v12 = vsel %vm195_vm5, %v183_v60, %v198_v1  ;;  %v463_v5 = vld [vmem:[#allocation7 + $0x80] sm:$0xff] }
 0x136   :  { %v207_v9 = vsel %vm195_vm5, %v189_v62, %v206_v7  ;;  %v204_v13 = vsel %vm194_vm6, %v201_v2, %v203_v8  ;;  %v200_v19 = vsel %vm194_vm6, %v197_v11, %v199_v12  ;;  %v464_v7 = vld [vmem:[#allocation7 + $0x88] sm:$0xff]  ;;  %v467_v12 = vld [vmem:[#allocation7 + $0xa0] sm:$0xff] }
 0x137   :  { %v208_v14 = vsel %vm194_vm6, %v205_v3, %v207_v9  ;;  %v1616_v17 = vmul.u32.u64.low %v209_v10, %v204_v13  ;;  %v1617_v18 = vmul.u32.u64.high %v209_v10, %v204_v13, %v1616_v17  ;;  %v216_v21 = vmul.u32 %v209_v10, %v200_v19  ;;  %v465_v9 = vld [vmem:[#allocation7 + $0x90] sm:$0xff] }
 0x138   :  { %v1613_v15 = vmul.u32.u64.low %v209_v10, %v208_v14  ;;  %v1614_v16 = vmul.u32.u64.high %v209_v10, %v208_v14, %v1613_v15  ;;  %v1235_v8 = vpack.c.bf16 %v464_v7, %v463_v5  ;;  %v466_v10 = vld [vmem:[#allocation7 + $0x98] sm:$0xff]  ;;  %v469_v14 = vld [vmem:[#allocation7 + $0xb0] sm:$0xff] }
 0x139   :  { %v219_v20 = vadd.s32 1, %v1617_v18  ;;  %v1238_v11 = vpack.c.bf16 %v466_v10, %v465_v9  ;;  %v470_v15 = vld [vmem:[#allocation7 + $0xb8] sm:$0xff] }
 0x13a   :  { %vm218_vm7 = vc.u32 %v1614_v16, %v1616_v17  ;;  %v217_v34 = vadd.s32 %v1616_v17, %v1614_v16  ;;  %1236 = vmatpush3.bf16.msra.mxu0 %v1235_v8  ;;  %v1244_v16 = vpack.c.bf16 %v470_v15, %v469_v14  ;;  %v471_v17 = vld [vmem:[#allocation7 + $0xc0] sm:$0xff] }
 0x13b   :  { %v220_v22 = vsel %vm218_vm7, %v219_v20, %v1617_v18  ;;  %1237 = vmatprep.subr.bf16.mxu0 %v1480_v6  ;;  %v472_v18 = vld [vmem:[#allocation7 + $0xc8] sm:$0xff]  ;;  %v473_v20 = vld [vmem:[#allocation7 + $0xd0] sm:$0xff] }
 0x13c   :  { %v221_v23 = vadd.s32 %v220_v22, %v216_v21  ;;  %v1247_v19 = vpack.c.bf16 %v472_v18, %v471_v17  ;;  %v474_v21 = vld [vmem:[#allocation7 + $0xd8] sm:$0xff] }
 0x13d   :  { %v1250_v22 = vpack.c.bf16 %v474_v21, %v473_v20 }
 0x13e   :  { %v222_v24 = vadd.s32 536870912, %v221_v23  ;;  %1239 = vmatpush3.bf16.msra.mxu0 %v1238_v11 }
 0x13f   :  { %1240 = vmatprep.subr.bf16.mxu0 %v1480_v6 }
 0x140   :  { %v223_v25 = vshrl.u32 %v222_v24, 30  ;;  %v476_v24 = vld [vmem:[#allocation7 + $0xe8] sm:$0xff] }
 0x142   :  { %v224_v26 = vshll.u32 %v223_v25, 30  ;;  %v247_v51 = vsub.s32 4, %v223_v25 }
 0x144   :  { %v225_v27 = vsub.s32 %v221_v23, %v224_v26  ;;  %v248_v55 = vsel %vm163_vm9, %v247_v51, %v223_v25  ;;  %v475_v23 = vld [vmem:[#allocation7 + $0xe0] sm:$0xff]  ;;  %v477_v26 = vld [vmem:[#allocation7 + $0xf0] sm:$0xff] }
 0x145   :  { %v250_v58 = vsel %vm162_vm10, 0, %v248_v55  ;;  %v1253_v25 = vpack.c.bf16 %v476_v24, %v475_v23 }
 0x146   :  { %v227_v28 = vsub.s32 0, %v225_v27  ;;  %v254_v59 = vadd.s32 3, %v250_v58 }
 0x148   :  { %v974_v29 = vmin.u32 %v227_v28, %v225_v27  ;;  %v255_v60 = vand.u32 3, %v254_v59 }
 0x14a   :  { %v229_v31 = vclz %v974_v29  ;;  %vm260_vm11 = vcmp.eq.s32.totalorder %v255_v60, 2  ;;  %vm257_vm12 = vcmp.eq.s32.totalorder %v255_v60, 0  ;;  %vm256_vm13 = vcmp.lt.s32.totalorder %v255_v60, 2  ;;  %v977_v29 = vld [vmem:[%s1778_s4] ss:$0 sm:$0xff] }
 0x14c   :  { %v975_v32 = vadd.s32 4294967294, %v229_v31 }
 0x14e   :  { %vm976_vm8 = vcmp.lt.s32.totalorder %v975_v32, 0 }
 0x14f   :  { %v232_v33 = vsel %vm976_vm8, 0, %v975_v32 }
 0x150   :  { %v233_v35 = vsub.s32 32, %v232_v33  ;;  %v237_v37 = vsub.s32 4294967266, %v232_v33  ;;  %v234_v38 = vshll.u32 %v225_v27, %v232_v33  ;;  %v478_v27 = vld [vmem:[#allocation7 + $0xf8] sm:$0xff] }
 0x151   :  { %v1256_v28 = vpack.c.bf16 %v478_v27, %v477_v26 }
 0x152   :  { %v235_v39 = vshrl.u32 %v217_v34, %v233_v35  ;;  %v238_v40 = vadd.s32 127, %v237_v37 }
 0x154   :  { %v236_v41 = vor.u32 %v235_v39, %v234_v38  ;;  %v239_v43 = vshll.u32 %v238_v40, 23 }
 0x156   :  { %v240_v45 = vor.u32 4788187, %v239_v43  ;;  %v243_v48 = vcvt.s32.f32 %v236_v41 }
 0x158   :  { %v241_v46 = vand.u32 2147483647, %v240_v45 }
 0x15a   :  { %v244_v49 = vmul.f32 %v243_v48, %v241_v46 }
 0x15c   :  { %v245_v52 = vxor.u32 2147483648, %v244_v49 }
 0x15e   :  { %v246_v54 = vsel %vm163_vm9, %v245_v52, %v244_v49 }
 0x15f   :  { %v249_v57 = vsel %vm162_vm10, %v1596_v30, %v246_v54  ;;  %v468_v30 = vld [vmem:[#allocation7 + $0xa8] sm:$0xff] }
 0x160   :  { %1338 = vcosq.f32 %v249_v57  ;;  %v1241_v13 = vpack.c.bf16 %v468_v30, %v467_v12 }
 0x161   :  { %1340 = vsinq.f32 %v249_v57 }
 0x162   :  { %1242 = vmatpush3.bf16.msra.mxu0 %v1241_v13 }
 0x163   :  { %1243 = vmatprep.subr.bf16.mxu0 %v1480_v6 }
 0x166   :  { %1245 = vmatpush3.bf16.msra.mxu0 %v1244_v16 }
 0x167   :  { %1246 = vmatprep.subr.bf16.mxu0 %v1480_v6 }
 0x16a   :  { %v1339_v61 = vpop.eup %1338  ;;  %1248 = vmatpush3.bf16.msra.mxu0 %v1247_v19 }
 0x16b   :  { %v1341_v62 = vpop.eup %1340  ;;  %v261_v63 = vxor.u32 2147483648, %v1339_v61  ;;  %1249 = vmatprep.subr.bf16.mxu0 %v1480_v6 }
 0x16c   :  { %v258_v1 = vxor.u32 2147483648, %v1341_v62 }
 0x16d   :  { %v262_v2 = vsel %vm260_vm11, %v261_v63, %v1341_v62 }
 0x16e   :  { %v259_v3 = vsel %vm257_vm12, %v1339_v61, %v258_v1  ;;  %1251 = vmatpush3.bf16.msra.mxu0 %v1250_v22 }
 0x16f   :  { %v263_v36 = vsel %vm256_vm13, %v259_v3, %v262_v2  ;;  %1252 = vmatprep.subr.bf16.mxu0 %v1480_v6 }
 0x170   :  { %v264_v4 = vsel %vm253_vm14, nan, %v263_v36 }
 0x171   :  { %1103 = vmatmul.mubr.f32.vlgmr.msra.gmra.mrb[0].mxu1 %v264_v4 }
 0x172   :  { %1172 = vmatprep.mubr.msk.f32.mxu1 %vm1479_vm0, %v1478_v0  ;;  %1254 = vmatpush3.bf16.msra.mxu0 %v1253_v25 }
 0x173   :  { %1255 = vmatprep.subr.bf16.mxu0 %v1480_v6 }
 0x176   :  { %1257 = vmatpush3.bf16.msra.mxu0 %v1256_v28 }
 0x177   :  { %1282 = vmatprep.subr.bf16.mxu0 %v1480_v6 }
 0x244   :  { %v354_v31 = vpop.f32.mrb[0].mxu1 }
 0x245   :  { %v1641_v32 = vadd.f32 %v977_v29, %v354_v31  ;;  %v1104_v33 = vpop.f32.mrb[1].mxu1 }
 0x247   :  { %v361_v34 = vand.u32 2139095040, %v1641_v32  ;;  %v358_v39 = vand.u32 2147483647, %v1641_v32  ;;  %vm360_vm7 = vcmp.lt.s32.totalorder %v1641_v32, 0  ;;  %vm450_vm12 = vweird.f32 %v1641_v32 }
 0x249   :  { %v362_v35 = vshrl.u32 %v361_v34, 23  ;;  %v365_v43 = vand.u32 8388607, %v358_v39  ;;  %vm359_vm8 = vcmp.le.f32.partialorder %v358_v39, 0.7853982 }
 0x24b   :  { %v978_v37 = vadd.s32 4294967169, %v362_v35  ;;  %v366_v61 = vor.u32 8388608, %v365_v43 }
 0x24d   :  { %v368_v38 = vadd.s32 1, %v978_v37  ;;  %v406_v12 = vshll.u32 %v366_v61, 8 }
 0x24f   :  { %vm369_vm15 = vcmp.gt.s32.totalorder %v368_v38, 0 }
 0x250   :  { %v370_v40 = vsel %vm369_vm15, %v368_v38, 0 }
 0x251   :  { %v372_v41 = vand.u32 31, %v370_v40  ;;  %v371_v46 = vshrl.u32 %v370_v40, 5 }
 0x253   :  { %v373_v45 = vsub.s32 32, %v372_v41  ;;  %v375_v48 = vshll.u32 %v1481_v42, %v372_v41  ;;  %v378_v49 = vshll.u32 %v1482_v44, %v372_v41  ;;  %v381_v54 = vshll.u32 %v1483_v47, %v372_v41 }
 0x254   :  { %v384_v57 = vshll.u32 %v1484_v50, %v372_v41  ;;  %v387_v59 = vshll.u32 %v1485_v53, %v372_v41  ;;  %vm390_vm1 = vcmp.lt.s32.totalorder %v371_v46, 1  ;;  %vm393_vm2 = vcmp.lt.s32.totalorder %v371_v46, 4 }
 0x255   :  { %v376_v51 = vshrl.u32 %v1482_v44, %v373_v45  ;;  %v379_v52 = vshrl.u32 %v1483_v47, %v373_v45  ;;  %v382_v55 = vshrl.u32 %v1484_v50, %v373_v45  ;;  %v385_v58 = vshrl.u32 %v1485_v53, %v373_v45 }
 0x256   :  { %v388_v60 = vshrl.u32 %v1486_v56, %v373_v45  ;;  %v374_v7 = vshrl.u32 %v1481_v42, %v373_v45  ;;  %vm392_vm3 = vcmp.lt.s32.totalorder %v371_v46, 3  ;;  %vm391_vm4 = vcmp.lt.s32.totalorder %v371_v46, 2 }
 0x257   :  { %v377_v62 = vor.u32 %v376_v51, %v375_v48  ;;  %v380_v63 = vor.u32 %v379_v52, %v378_v49  ;;  %v383_v1 = vor.u32 %v382_v55, %v381_v54  ;;  %v386_v2 = vor.u32 %v385_v58, %v384_v57 }
 0x258   :  { %v389_v3 = vor.u32 %v388_v60, %v387_v59 }
 0x259   :  { %v395_v36 = vsel %vm393_vm2, %v383_v1, 2102212464  ;;  %v398_v4 = vsel %vm390_vm1, %v377_v62, %v380_v63  ;;  %v402_v5 = vsel %vm390_vm1, %v380_v63, %v383_v1  ;;  %v399_v8 = vsel %vm393_vm2, %v386_v2, 920167782 }
 0x25a   :  { %v403_v9 = vsel %vm393_vm2, %v389_v3, 1326507024  ;;  %v400_v10 = vsel %vm392_vm3, %v383_v1, %v399_v8  ;;  %v394_v30 = vsel %vm390_vm1, %v374_v7, %v377_v62  ;;  %v396_v13 = vsel %vm392_vm3, %v380_v63, %v395_v36  ;;  %v662_v8 = vld [vmem:[#allocation7 + $0x100] sm:$0xff] }
 0x25b   :  { %v404_v11 = vsel %vm392_vm3, %v386_v2, %v403_v9  ;;  %v401_v14 = vsel %vm391_vm4, %v398_v4, %v400_v10  ;;  %v397_v20 = vsel %vm391_vm4, %v394_v30, %v396_v13  ;;  %v663_v9 = vld [vmem:[#allocation7 + $0x108] sm:$0xff]  ;;  %v666_v13 = vld [vmem:[#allocation7 + $0x120] sm:$0xff] }
 0x25c   :  { %v405_v15 = vsel %vm391_vm4, %v402_v5, %v404_v11  ;;  %v1661_v18 = vmul.u32.u64.low %v406_v12, %v401_v14  ;;  %v1662_v19 = vmul.u32.u64.high %v406_v12, %v401_v14, %v1661_v18  ;;  %v413_v22 = vmul.u32 %v406_v12, %v397_v20  ;;  %v664_v11 = vld [vmem:[#allocation7 + $0x110] sm:$0xff] }
 0x25d   :  { %v1658_v16 = vmul.u32.u64.low %v406_v12, %v405_v15  ;;  %v1659_v17 = vmul.u32.u64.high %v406_v12, %v405_v15, %v1658_v16  ;;  %v1259_v10 = vpack.c.bf16 %v663_v9, %v662_v8  ;;  %v665_v12 = vld [vmem:[#allocation7 + $0x118] sm:$0xff]  ;;  %v668_v15 = vld [vmem:[#allocation7 + $0x130] sm:$0xff] }
 0x25e   :  { %v416_v21 = vadd.s32 1, %v1662_v19  ;;  %v1262_v30 = vpack.c.bf16 %v665_v12, %v664_v11  ;;  %v672_v20 = vld [vmem:[#allocation7 + $0x150] sm:$0xff] }
 0x25f   :  { %vm415_vm5 = vc.u32 %v1659_v17, %v1661_v18  ;;  %v414_v37 = vadd.s32 %v1661_v18, %v1659_v17  ;;  %1260 = vmatpush3.bf16.msra.mxu1 %v1259_v10  ;;  %v670_v17 = vld [vmem:[#allocation7 + $0x140] sm:$0xff]  ;;  %v671_v18 = vld [vmem:[#allocation7 + $0x148] sm:$0xff] }
 0x260   :  { %v417_v23 = vsel %vm415_vm5, %v416_v21, %v1662_v19  ;;  %1261 = vmatprep.subr.bf16.mxu1 %v1480_v6  ;;  %v1271_v19 = vpack.c.bf16 %v671_v18, %v670_v17  ;;  %v673_v21 = vld [vmem:[#allocation7 + $0x158] sm:$0xff] }
 0x261   :  { %v418_v24 = vadd.s32 %v417_v23, %v413_v22  ;;  %v1274_v22 = vpack.c.bf16 %v673_v21, %v672_v20  ;;  %v674_v23 = vld [vmem:[#allocation7 + $0x160] sm:$0xff] }
 0x263   :  { %v419_v25 = vadd.s32 536870912, %v418_v24  ;;  %1263 = vmatpush3.bf16.msra.mxu1 %v1262_v30 }
 0x264   :  { %1264 = vmatprep.subr.bf16.mxu1 %v1480_v6 }
 0x265   :  { %v420_v26 = vshrl.u32 %v419_v25, 30 }
 0x267   :  { %v421_v27 = vshll.u32 %v420_v26, 30  ;;  %v444_v55 = vsub.s32 4, %v420_v26 }
 0x269   :  { %v422_v28 = vsub.s32 %v418_v24, %v421_v27  ;;  %v445_v59 = vsel %vm360_vm7, %v444_v55, %v420_v26  ;;  %v675_v24 = vld [vmem:[#allocation7 + $0x168] sm:$0xff]  ;;  %v676_v26 = vld [vmem:[#allocation7 + $0x170] sm:$0xff]  ;;  %v677_v27 = vld [vmem:[#allocation7 + $0x178] sm:$0xff] }
 0x26a   :  { %v447_v61 = vsel %vm359_vm8, 0, %v445_v59  ;;  %v1277_v25 = vpack.c.bf16 %v675_v24, %v674_v23 }
 0x26b   :  { %v424_v29 = vsub.s32 0, %v422_v28  ;;  %v451_v62 = vadd.s32 3, %v447_v61 }
 0x26d   :  { %v979_v31 = vmin.u32 %v424_v29, %v422_v28  ;;  %v452_v63 = vand.u32 3, %v451_v62  ;;  %v983_v29 = vld [vmem:[%s1778_s4 + $0x1] ss:$0 sm:$0xff] }
 0x26f   :  { %v426_v33 = vclz %v979_v31  ;;  %vm457_vm9 = vcmp.eq.s32.totalorder %v452_v63, 2  ;;  %vm454_vm10 = vcmp.eq.s32.totalorder %v452_v63, 0  ;;  %vm453_vm11 = vcmp.lt.s32.totalorder %v452_v63, 2 }
 0x271   :  { %v980_v34 = vadd.s32 4294967294, %v426_v33 }
 0x273   :  { %vm981_vm6 = vcmp.lt.s32.totalorder %v980_v34, 0 }
 0x274   :  { %v429_v35 = vsel %vm981_vm6, 0, %v980_v34 }
 0x275   :  { %v430_v38 = vsub.s32 32, %v429_v35  ;;  %v434_v40 = vsub.s32 4294967266, %v429_v35  ;;  %v431_v41 = vshll.u32 %v422_v28, %v429_v35  ;;  %v1280_v28 = vpack.c.bf16 %v677_v27, %v676_v26 }
 0x277   :  { %v432_v43 = vshrl.u32 %v414_v37, %v430_v38  ;;  %v435_v45 = vadd.s32 127, %v434_v40 }
 0x279   :  { %v433_v46 = vor.u32 %v432_v43, %v431_v41  ;;  %v436_v48 = vshll.u32 %v435_v45, 23 }
 0x27b   :  { %v437_v49 = vor.u32 4788187, %v436_v48  ;;  %v440_v52 = vcvt.s32.f32 %v433_v46 }
 0x27d   :  { %v438_v51 = vand.u32 2147483647, %v437_v49 }
 0x27f   :  { %v441_v54 = vmul.f32 %v440_v52, %v438_v51 }
 0x281   :  { %v442_v57 = vxor.u32 2147483648, %v441_v54 }
 0x283   :  { %v443_v58 = vsel %vm360_vm7, %v442_v57, %v441_v54 }
 0x284   :  { %v446_v60 = vsel %vm359_vm8, %v1641_v32, %v443_v58  ;;  %v667_v32 = vld [vmem:[#allocation7 + $0x128] sm:$0xff] }
 0x285   :  { %1342 = vcosq.f32 %v446_v60  ;;  %v1265_v14 = vpack.c.bf16 %v667_v32, %v666_v13 }
 0x286   :  { %1344 = vsinq.f32 %v446_v60 }
 0x287   :  { %1266 = vmatpush3.bf16.msra.mxu1 %v1265_v14 }
 0x288   :  { %1267 = vmatprep.subr.bf16.mxu1 %v1480_v6 }
 0x28f   :  { %v1343_v1 = vpop.eup %1342 }
 0x290   :  { %v1345_v2 = vpop.eup %1344  ;;  %v458_v3 = vxor.u32 2147483648, %v1343_v1 }
 0x291   :  { %v455_v36 = vxor.u32 2147483648, %v1345_v2 }
 0x292   :  { %v459_v4 = vsel %vm457_vm9, %v458_v3, %v1345_v2 }
 0x293   :  { %v456_v5 = vsel %vm454_vm10, %v1343_v1, %v455_v36 }
 0x294   :  { %v460_v39 = vsel %vm453_vm11, %v456_v5, %v459_v4 }
 0x295   :  { %v461_v7 = vsel %vm450_vm12, nan, %v460_v39 }
 0x296   :  { %1138 = vmatmul.mubr.f32.vlgmr.msra.gmra.mrb[2].mxu0 %v461_v7 }
 0x297   :  { %1207 = vmatprep.mubr.msk.f32.mxu0 %vm1479_vm0, %v1478_v0  ;;  %v669_v0 = vld [vmem:[#allocation7 + $0x138] sm:$0xff] }
 0x298   :  { %v1268_v16 = vpack.c.bf16 %v669_v0, %v668_v15 }
 0x29a   :  { %1269 = vmatpush3.bf16.msra.mxu1 %v1268_v16 }
 0x29b   :  { %1270 = vmatprep.subr.bf16.mxu1 %v1480_v6 }
 0x29e   :  { %1272 = vmatpush3.bf16.msra.mxu1 %v1271_v19 }
 0x29f   :  { %1273 = vmatprep.subr.bf16.mxu1 %v1480_v6 }
 0x2a2   :  { %1275 = vmatpush3.bf16.msra.mxu1 %v1274_v22 }
 0x2a3   :  { %1276 = vmatprep.subr.bf16.mxu1 %v1480_v6 }
 0x2a6   :  { %1278 = vmatpush3.bf16.msra.mxu1 %v1277_v25 }
 0x2a7   :  { %1279 = vmatprep.subr.bf16.mxu1 %v1480_v6 }
 0x2aa   :  { %1281 = vmatpush3.bf16.msra.mxu1 %v1280_v28 }
 0x369   :  { %v553_v31 = vpop.f32.mrb[2].mxu0 }
 0x36a   :  { %v1685_v33 = vadd.f32 %v983_v29, %v553_v31  ;;  %v1139_v34 = vpop.f32.mrb[3].mxu0 }
 0x36c   :  { %v560_v35 = vand.u32 2139095040, %v1685_v33  ;;  %v557_v41 = vand.u32 2147483647, %v1685_v33  ;;  %vm559_vm4 = vcmp.lt.s32.totalorder %v1685_v33, 0  ;;  %vm649_vm9 = vweird.f32 %v1685_v33 }
 0x36e   :  { %v561_v37 = vshrl.u32 %v560_v35, 23  ;;  %v564_v46 = vand.u32 8388607, %v557_v41  ;;  %vm558_vm5 = vcmp.le.f32.partialorder %v557_v41, 0.7853982 }
 0x370   :  { %v984_v38 = vadd.s32 4294967169, %v561_v37  ;;  %v565_v63 = vor.u32 8388608, %v564_v46 }
 0x372   :  { %v567_v40 = vadd.s32 1, %v984_v38  ;;  %v605_v30 = vshll.u32 %v565_v63, 8 }
 0x374   :  { %vm568_vm0 = vcmp.gt.s32.totalorder %v567_v40, 0 }
 0x375   :  { %v569_v43 = vsel %vm568_vm0, %v567_v40, 0 }
 0x376   :  { %v571_v45 = vand.u32 31, %v569_v43  ;;  %v570_v49 = vshrl.u32 %v569_v43, 5 }
 0x378   :  { %v572_v48 = vsub.s32 32, %v571_v45  ;;  %v574_v51 = vshll.u32 %v1481_v42, %v571_v45  ;;  %v577_v52 = vshll.u32 %v1482_v44, %v571_v45  ;;  %v580_v57 = vshll.u32 %v1483_v47, %v571_v45 }
 0x379   :  { %v583_v59 = vshll.u32 %v1484_v50, %v571_v45  ;;  %v586_v61 = vshll.u32 %v1485_v53, %v571_v45  ;;  %vm589_vm13 = vcmp.lt.s32.totalorder %v570_v49, 1  ;;  %vm592_vm14 = vcmp.lt.s32.totalorder %v570_v49, 4 }
 0x37a   :  { %v575_v54 = vshrl.u32 %v1482_v44, %v572_v48  ;;  %v578_v55 = vshrl.u32 %v1483_v47, %v572_v48  ;;  %v581_v58 = vshrl.u32 %v1484_v50, %v572_v48  ;;  %v584_v60 = vshrl.u32 %v1485_v53, %v572_v48 }
 0x37b   :  { %v587_v62 = vshrl.u32 %v1486_v56, %v572_v48  ;;  %v573_v8 = vshrl.u32 %v1481_v42, %v572_v48  ;;  %vm591_vm15 = vcmp.lt.s32.totalorder %v570_v49, 3  ;;  %vm590_vm1 = vcmp.lt.s32.totalorder %v570_v49, 2 }
 0x37c   :  { %v576_v1 = vor.u32 %v575_v54, %v574_v51  ;;  %v579_v2 = vor.u32 %v578_v55, %v577_v52  ;;  %v582_v3 = vor.u32 %v581_v58, %v580_v57  ;;  %v585_v36 = vor.u32 %v584_v60, %v583_v59 }
 0x37d   :  { %v588_v4 = vor.u32 %v587_v62, %v586_v61 }
 0x37e   :  { %v594_v5 = vsel %vm592_vm14, %v582_v3, 2102212464  ;;  %v597_v39 = vsel %vm589_vm13, %v576_v1, %v579_v2  ;;  %v601_v7 = vsel %vm589_vm13, %v579_v2, %v582_v3  ;;  %v598_v9 = vsel %vm592_vm14, %v585_v36, 920167782 }
 0x37f   :  { %v602_v10 = vsel %vm592_vm14, %v588_v4, 1326507024  ;;  %v599_v11 = vsel %vm591_vm15, %v582_v3, %v598_v9  ;;  %v593_v13 = vsel %vm589_vm13, %v573_v8, %v576_v1  ;;  %v595_v32 = vsel %vm591_vm15, %v579_v2, %v594_v5  ;;  %v860_v8 = vld [vmem:[#allocation8] sm:$0xff]  ;;  %v861_v9 = vld [vmem:[#allocation8 + $0x8] sm:$0xff] }
 0x380   :  { %v603_v12 = vsel %vm591_vm15, %v585_v36, %v602_v10  ;;  %v600_v14 = vsel %vm590_vm1, %v597_v39, %v599_v11  ;;  %v596_v19 = vsel %vm590_vm1, %v593_v13, %v595_v32  ;;  %v1283_v10 = vpack.c.bf16 %v861_v9, %v860_v8  ;;  %v862_v11 = vld [vmem:[#allocation8 + $0x10] sm:$0xff]  ;;  %v864_v13 = vld [vmem:[#allocation8 + $0x20] sm:$0xff]  ;;  %v865_v32 = vld [vmem:[#allocation8 + $0x28] sm:$0xff] }
 0x381   :  { %v604_v15 = vsel %vm590_vm1, %v601_v7, %v603_v12  ;;  %v1705_v17 = vmul.u32.u64.low %v605_v30, %v600_v14  ;;  %v1706_v18 = vmul.u32.u64.high %v605_v30, %v600_v14, %v1705_v17  ;;  %v612_v21 = vmul.u32 %v605_v30, %v596_v19  ;;  %v863_v12 = vld [vmem:[#allocation8 + $0x18] sm:$0xff]  ;;  %v870_v19 = vld [vmem:[#allocation8 + $0x50] sm:$0xff] }
 0x382   :  { %v1702_v0 = vmul.u32.u64.low %v605_v30, %v604_v15  ;;  %v1703_v16 = vmul.u32.u64.high %v605_v30, %v604_v15, %v1702_v0  ;;  %1284 = vmatpush3.bf16.msra.mxu0 %v1283_v10  ;;  %v1286_v30 = vpack.c.bf16 %v863_v12, %v862_v11  ;;  %v1289_v14 = vpack.c.bf16 %v865_v32, %v864_v13  ;;  %v867_v15 = vld [vmem:[#allocation8 + $0x38] sm:$0xff] }
 0x383   :  { %v615_v20 = vadd.s32 1, %v1706_v18  ;;  %1285 = vmatprep.subr.bf16.mxu0 %v1480_v6 }
 0x384   :  { %vm614_vm2 = vc.u32 %v1703_v16, %v1705_v17  ;;  %v613_v37 = vadd.s32 %v1705_v17, %v1703_v16  ;;  %v868_v16 = vld [vmem:[#allocation8 + $0x40] sm:$0xff]  ;;  %v869_v17 = vld [vmem:[#allocation8 + $0x48] sm:$0xff] }
 0x385   :  { %v616_v22 = vsel %vm614_vm2, %v615_v20, %v1706_v18  ;;  %v1295_v18 = vpack.c.bf16 %v869_v17, %v868_v16  ;;  %v871_v20 = vld [vmem:[#allocation8 + $0x58] sm:$0xff] }
 0x386   :  { %v617_v23 = vadd.s32 %v616_v22, %v612_v21  ;;  %1287 = vmatpush3.bf16.msra.mxu0 %v1286_v30  ;;  %v1298_v21 = vpack.c.bf16 %v871_v20, %v870_v19  ;;  %v872_v22 = vld [vmem:[#allocation8 + $0x60] sm:$0xff] }
 0x387   :  { %1288 = vmatprep.subr.bf16.mxu0 %v1480_v6 }
 0x388   :  { %v618_v24 = vadd.s32 536870912, %v617_v23 }
 0x38a   :  { %v619_v25 = vshrl.u32 %v618_v24, 30  ;;  %1290 = vmatpush3.bf16.msra.mxu0 %v1289_v14 }
 0x38b   :  { %1291 = vmatprep.subr.bf16.mxu0 %v1480_v6 }
 0x38c   :  { %v620_v26 = vshll.u32 %v619_v25, 30  ;;  %v643_v57 = vsub.s32 4, %v619_v25 }
 0x38e   :  { %v621_v27 = vsub.s32 %v617_v23, %v620_v26  ;;  %v644_v60 = vsel %vm559_vm4, %v643_v57, %v619_v25  ;;  %v873_v23 = vld [vmem:[#allocation8 + $0x68] sm:$0xff]  ;;  %v874_v25 = vld [vmem:[#allocation8 + $0x70] sm:$0xff]  ;;  %v875_v26 = vld [vmem:[#allocation8 + $0x78] sm:$0xff] }
 0x38f   :  { %v646_v62 = vsel %vm558_vm5, 0, %v644_v60  ;;  %v1301_v24 = vpack.c.bf16 %v873_v23, %v872_v22 }
 0x390   :  { %v623_v28 = vsub.s32 0, %v621_v27  ;;  %v650_v63 = vadd.s32 3, %v646_v62 }
 0x392   :  { %v985_v29 = vmin.u32 %v623_v28, %v621_v27  ;;  %v651_v1 = vand.u32 3, %v650_v63  ;;  %v989_v28 = vld [vmem:[%s1778_s4 + $0x2] ss:$0 sm:$0xff] }
 0x394   :  { %v625_v31 = vclz %v985_v29  ;;  %vm656_vm6 = vcmp.eq.s32.totalorder %v651_v1, 2  ;;  %vm653_vm7 = vcmp.eq.s32.totalorder %v651_v1, 0  ;;  %vm652_vm8 = vcmp.lt.s32.totalorder %v651_v1, 2 }
 0x396   :  { %v986_v34 = vadd.s32 4294967294, %v625_v31 }
 0x398   :  { %vm987_vm3 = vcmp.lt.s32.totalorder %v986_v34, 0 }
 0x399   :  { %v628_v35 = vsel %vm987_vm3, 0, %v986_v34 }
 0x39a   :  { %v629_v38 = vsub.s32 32, %v628_v35  ;;  %v633_v40 = vsub.s32 4294967266, %v628_v35  ;;  %v630_v43 = vshll.u32 %v621_v27, %v628_v35  ;;  %v1304_v27 = vpack.c.bf16 %v875_v26, %v874_v25 }
 0x39c   :  { %v631_v45 = vshrl.u32 %v613_v37, %v629_v38  ;;  %v634_v46 = vadd.s32 127, %v633_v40 }
 0x39e   :  { %v632_v48 = vor.u32 %v631_v45, %v630_v43  ;;  %v635_v49 = vshll.u32 %v634_v46, 23 }
 0x3a0   :  { %v636_v51 = vor.u32 4788187, %v635_v49  ;;  %v639_v54 = vcvt.s32.f32 %v632_v48 }
 0x3a2   :  { %v637_v52 = vand.u32 2147483647, %v636_v51 }
 0x3a4   :  { %v640_v55 = vmul.f32 %v639_v54, %v637_v52 }
 0x3a6   :  { %v641_v58 = vxor.u32 2147483648, %v640_v55 }
 0x3a8   :  { %v642_v59 = vsel %vm559_vm4, %v641_v58, %v640_v55 }
 0x3a9   :  { %v645_v61 = vsel %vm558_vm5, %v1685_v33, %v642_v59  ;;  %v866_v33 = vld [vmem:[#allocation8 + $0x30] sm:$0xff] }
 0x3aa   :  { %1346 = vcosq.f32 %v645_v61  ;;  %v1292_v0 = vpack.c.bf16 %v867_v15, %v866_v33 }
 0x3ab   :  { %1348 = vsinq.f32 %v645_v61 }
 0x3ac   :  { %1293 = vmatpush3.bf16.msra.mxu0 %v1292_v0 }
 0x3ad   :  { %1294 = vmatprep.subr.bf16.mxu0 %v1480_v6 }
 0x3b0   :  { %1296 = vmatpush3.bf16.msra.mxu0 %v1295_v18 }
 0x3b1   :  { %1297 = vmatprep.subr.bf16.mxu0 %v1480_v6 }
 0x3b4   :  { %v1347_v2 = vpop.eup %1346  ;;  %1299 = vmatpush3.bf16.msra.mxu0 %v1298_v21 }
 0x3b5   :  { %v1349_v3 = vpop.eup %1348  ;;  %v657_v36 = vxor.u32 2147483648, %v1347_v2  ;;  %1300 = vmatprep.subr.bf16.mxu0 %v1480_v6 }
 0x3b6   :  { %v654_v4 = vxor.u32 2147483648, %v1349_v3 }
 0x3b7   :  { %v658_v5 = vsel %vm656_vm6, %v657_v36, %v1349_v3 }
 0x3b8   :  { %v655_v39 = vsel %vm653_vm7, %v1347_v2, %v654_v4  ;;  %1302 = vmatpush3.bf16.msra.mxu0 %v1301_v24 }
 0x3b9   :  { %v659_v41 = vsel %vm652_vm8, %v655_v39, %v658_v5  ;;  %1303 = vmatprep.subr.bf16.mxu0 %v1480_v6 }
 0x3ba   :  { %v660_v7 = vsel %vm649_vm9, nan, %v659_v41 }
 0x3bb   :  { %1173 = vmatmul.mubr.f32.vlgmr.msra.gmra.mrb[2].mxu1 %v660_v7 }
 0x3bc   :  { %1305 = vmatpush3.bf16.msra.mxu0 %v1304_v27 }
 0x48e   :  { %v752_v29 = vpop.f32.mrb[2].mxu1 }
 0x48f   :  { %v1727_v31 = vadd.f32 %v989_v28, %v752_v29  ;;  %v1174_v34 = vpop.f32.mrb[3].mxu1 }
 0x491   :  { %v759_v35 = vand.u32 2139095040, %v1727_v31  ;;  %v756_v43 = vand.u32 2147483647, %v1727_v31  ;;  %vm758_vm1 = vcmp.lt.s32.totalorder %v1727_v31, 0  ;;  %vm848_vm6 = vweird.f32 %v1727_v31 }
 0x493   :  { %v760_v37 = vshrl.u32 %v759_v35, 23  ;;  %v763_v6 = vand.u32 8388607, %v756_v43  ;;  %vm757_vm2 = vcmp.le.f32.partialorder %v756_v43, 0.7853982 }
 0x495   :  { %v990_v38 = vadd.s32 4294967169, %v760_v37  ;;  %v764_v63 = vor.u32 8388608, %v763_v6 }
 0x497   :  { %v766_v40 = vadd.s32 1, %v990_v38 }
 0x499   :  { %vm767_vm10 = vcmp.gt.s32.totalorder %v766_v40, 0 }
 0x49a   :  { %v768_v45 = vsel %vm767_vm10, %v766_v40, 0 }
 0x49b   :  { %v770_v46 = vand.u32 31, %v768_v45  ;;  %v769_v49 = vshrl.u32 %v768_v45, 5 }
 0x49d   :  { %v771_v48 = vsub.s32 32, %v770_v46  ;;  %v773_v51 = vshll.u32 %v1481_v42, %v770_v46  ;;  %v776_v52 = vshll.u32 %v1482_v44, %v770_v46  ;;  %v779_v57 = vshll.u32 %v1483_v47, %v770_v46 }
 0x49e   :  { %v782_v59 = vshll.u32 %v1484_v50, %v770_v46  ;;  %v785_v61 = vshll.u32 %v1485_v53, %v770_v46  ;;  %vm788_vm11 = vcmp.lt.s32.totalorder %v769_v49, 1  ;;  %vm791_vm12 = vcmp.lt.s32.totalorder %v769_v49, 4 }
 0x49f   :  { %v774_v54 = vshrl.u32 %v1482_v44, %v771_v48  ;;  %v777_v55 = vshrl.u32 %v1483_v47, %v771_v48  ;;  %v780_v58 = vshrl.u32 %v1484_v50, %v771_v48  ;;  %v783_v60 = vshrl.u32 %v1485_v53, %v771_v48 }
 0x4a0   :  { %v786_v62 = vshrl.u32 %v1486_v56, %v771_v48  ;;  %v772_v39 = vshrl.u32 %v1481_v42, %v771_v48  ;;  %vm790_vm0 = vcmp.lt.s32.totalorder %v769_v49, 3  ;;  %vm789_vm13 = vcmp.lt.s32.totalorder %v769_v49, 2 }
 0x4a1   :  { %v775_v1 = vor.u32 %v774_v54, %v773_v51  ;;  %v778_v2 = vor.u32 %v777_v55, %v776_v52  ;;  %v781_v3 = vor.u32 %v780_v58, %v779_v57  ;;  %v784_v36 = vor.u32 %v783_v60, %v782_v59 }
 0x4a2   :  { %v787_v44 = vor.u32 %v786_v62, %v785_v61  ;;  %v804_v56 = vshll.u32 %v764_v63, 8 }
 0x4a3   :  { %v793_v4 = vsel %vm791_vm12, %v781_v3, 2102212464  ;;  %v796_v47 = vsel %vm788_vm11, %v775_v1, %v778_v2  ;;  %v800_v5 = vsel %vm788_vm11, %v778_v2, %v781_v3  ;;  %v797_v50 = vsel %vm791_vm12, %v784_v36, 920167782 }
 0x4a4   :  { %v801_v41 = vsel %vm791_vm12, %v787_v44, 1326507024  ;;  %v798_v53 = vsel %vm790_vm0, %v781_v3, %v797_v50  ;;  %v792_v8 = vsel %vm788_vm11, %v772_v39, %v775_v1  ;;  %v794_v9 = vsel %vm790_vm0, %v778_v2, %v793_v4  ;;  %v994_v2 = vld [vmem:[%s1780_s6] ss:$0 sm:$0xff] }
 0x4a5   :  { %v802_v7 = vsel %vm790_vm0, %v784_v36, %v801_v41  ;;  %v799_v10 = vsel %vm789_vm13, %v796_v47, %v798_v53  ;;  %v795_v14 = vsel %vm789_vm13, %v792_v8, %v794_v9 }
 0x4a6   :  { %v803_v11 = vsel %vm789_vm13, %v800_v5, %v802_v7  ;;  %v1747_v13 = vmul.u32.u64.low %v804_v56, %v799_v10  ;;  %v1748_v32 = vmul.u32.u64.high %v804_v56, %v799_v10, %v1747_v13  ;;  %v811_v33 = vmul.u32 %v804_v56, %v795_v14 }
 0x4a7   :  { %v1744_v12 = vmul.u32.u64.low %v804_v56, %v803_v11  ;;  %v1745_v30 = vmul.u32.u64.high %v804_v56, %v803_v11, %v1744_v12 }
 0x4a8   :  { %v814_v42 = vadd.s32 1, %v1748_v32 }
 0x4a9   :  { %vm813_vm14 = vc.u32 %v1745_v30, %v1747_v13  ;;  %v812_v25 = vadd.s32 %v1747_v13, %v1745_v30 }
 0x4aa   :  { %v815_v15 = vsel %vm813_vm14, %v814_v42, %v1748_v32 }
 0x4ab   :  { %v816_v0 = vadd.s32 %v815_v15, %v811_v33 }
 0x4ad   :  { %v817_v16 = vadd.s32 536870912, %v816_v0 }
 0x4af   :  { %v818_v17 = vshrl.u32 %v817_v16, 30 }
 0x4b1   :  { %v819_v18 = vshll.u32 %v818_v17, 30  ;;  %v842_v6 = vsub.s32 4, %v818_v17 }
 0x4b3   :  { %v820_v19 = vsub.s32 %v816_v0, %v819_v18  ;;  %v843_v51 = vsel %vm758_vm1, %v842_v6, %v818_v17 }
 0x4b4   :  { %v845_v54 = vsel %vm757_vm2, 0, %v843_v51 }
 0x4b5   :  { %v822_v20 = vsub.s32 0, %v820_v19  ;;  %v849_v55 = vadd.s32 3, %v845_v54 }
 0x4b7   :  { %v991_v21 = vmin.u32 %v822_v20, %v820_v19  ;;  %v850_v57 = vand.u32 3, %v849_v55 }
 0x4b9   :  { %v824_v22 = vclz %v991_v21  ;;  %vm855_vm3 = vcmp.eq.s32.totalorder %v850_v57, 2  ;;  %vm852_vm4 = vcmp.eq.s32.totalorder %v850_v57, 0  ;;  %vm851_vm5 = vcmp.lt.s32.totalorder %v850_v57, 2 }
 0x4bb   :  { %v992_v23 = vadd.s32 4294967294, %v824_v22 }
 0x4bd   :  { %vm993_vm15 = vcmp.lt.s32.totalorder %v992_v23, 0 }
 0x4be   :  { %v827_v24 = vsel %vm993_vm15, 0, %v992_v23 }
 0x4bf   :  { %v828_v26 = vsub.s32 32, %v827_v24  ;;  %v832_v27 = vsub.s32 4294967266, %v827_v24  ;;  %v829_v28 = vshll.u32 %v820_v19, %v827_v24 }
 0x4c1   :  { %v830_v29 = vshrl.u32 %v812_v25, %v828_v26  ;;  %v833_v34 = vadd.s32 127, %v832_v27 }
 0x4c3   :  { %v831_v35 = vor.u32 %v830_v29, %v829_v28  ;;  %v834_v37 = vshll.u32 %v833_v34, 23 }
 0x4c5   :  { %v835_v38 = vor.u32 4788187, %v834_v37  ;;  %v838_v45 = vcvt.s32.f32 %v831_v35 }
 0x4c7   :  { %v836_v40 = vand.u32 2147483647, %v835_v38 }
 0x4c9   :  { %v839_v46 = vmul.f32 %v838_v45, %v836_v40 }
 0x4cb   :  { %v840_v48 = vxor.u32 2147483648, %v839_v46 }
 0x4cd   :  { %v841_v49 = vsel %vm758_vm1, %v840_v48, %v839_v46 }
 0x4ce   :  { %v844_v52 = vsel %vm757_vm2, %v1727_v31, %v841_v49 }
 0x4cf   :  { %1350 = vcosq.f32 %v844_v52 }
 0x4d0   :  { %1352 = vsinq.f32 %v844_v52 }
 0x4d9   :  { %v1351_v58 = vpop.eup %1350 }
 0x4da   :  { %v1353_v59 = vpop.eup %1352  ;;  %v856_v60 = vxor.u32 2147483648, %v1351_v58 }
 0x4db   :  { %v853_v61 = vxor.u32 2147483648, %v1353_v59 }
 0x4dc   :  { %v857_v62 = vsel %vm855_vm3, %v856_v60, %v1353_v59 }
 0x4dd   :  { %v854_v63 = vsel %vm852_vm4, %v1351_v58, %v853_v61 }
 0x4de   :  { %v858_v43 = vsel %vm851_vm5, %v854_v63, %v857_v62 }
 0x4df   :  { %v859_v1 = vsel %vm848_vm6, nan, %v858_v43 }
 0x4e0   :  { %1208 = vmatmul.mubr.f32.vlgmr.msra.gmra.mrb[4].mxu0 %v859_v1 }
 0x5b3   :  { %v949_v3 = vpop.f32.mrb[4].mxu0 }
 0x5b4   :  { %v950_v36 = vadd.f32 %v994_v2, %v949_v3  ;;  %v1209_v44 = vpop.f32.mrb[5].mxu0 }
 0x5b6   :  { %953 = vst [vmem:[#allocation10] sm:$0xff] %v950_v36 }
 0x5b7   :  { %1453 = shalt.err (!%p1450_p8)
}
 0x5b8   :  { %s1454_s12 = scalar_lea.hbm %s1781_s7, 128 }
 0x5b9   :  { %p1455_p9 = scmp.ne.s32.totalorder %s1781_s7, %s1454_s12  ;;  %p1458_p10 = scmp.lt.u32.totalorder %s1454_s12, %s1781_s7 }
 0x5bb   :  { %p1460_p11 = pnand %p1458_p10, %p1455_p9 }
 0x5bd   :  { %1463 = shalt.err (!%p1460_p11)
}
 0x5be   :  { %963 = dma.vmem_to_hbm [thread:$0]  %s961_s10, 128, %s1781_s7, [#allocation4]  }
 0x5bf   :  { %1470 = dma.done.wait [#allocation4], 128  }
 0x5c0   :  { %1471 = vsyncadd [#allocation4], 4294967168 }
 0x5c1   :  { %967 = vsyncpa [#allocation3], 1 }
 0x5c2   :  { %968 = vsyncpa [#allocation6], 1 }
 0x5c3   :  { %969 = vsyncpa [#allocation9], 1 }
 0x5c4   :  { %970 = vsyncpa [#allocation4], 1 }

// kernel: tpu_custom_call.1
= control target key start
LH: loop header
LB: loop body
LE: loop exit
PB: predicated region body
PF: predicated region fallthrough
CT: control target
= control target key end

     0   :  { %12 = vsyncpa [#allocation3], 0  ;;  %s1774_s0 = inlined_call_operand.hbm [shape: f32[8,8], index: 0, kind: input, shape index: {}]   ;;  %s1775_s1 = inlined_call_operand.hbm [shape: f32[8,128], index: 1, kind: input, shape index: {}]   ;;  %s1776_s2 = inlined_call_operand.vmem [shape: f32[1,128], index: 2, kind: input, shape index: {}]   ;;  %s1777_s3 = inlined_call_operand.hbm [shape: f32[3,128,128], index: 3, kind: input, shape index: {}]   ;;  %s1778_s4 = inlined_call_operand.vmem [shape: f32[3,1,128], index: 4, kind: input, shape index: {}]   ;;  %s1779_s5 = inlined_call_operand.hbm [shape: f32[128,128], index: 5, kind: input, shape index: {}]   ;;  %s1780_s6 = inlined_call_operand.vmem [shape: f32[1,128], index: 6, kind: input, shape index: {}]   ;;  %s1781_s7 = inlined_call_operand.hbm [shape: f32[8,128], index: 7, kind: output, shape index: {}]  }
   0x1   :  { %13 = vsyncpa [#allocation6], 0 }
   0x2   :  { %14 = vsyncpa [#allocation9], 0 }
   0x3   :  { %15 = vsyncpa [#allocation4], 0  ;;  %s1472_s24 = smov [#allocation5]   ;;  %s1473_s26 = smov [#allocation2]  }
   0x4   :  { %s32_s25 = sshll.u32 %s1472_s24, 4  ;;  %s22_s27 = sshll.u32 %s1473_s26, 4  ;;  %s33_s25 = int_to_ptr.vmem [resolvable:$true] %s32_s25  ;;  %s23_s27 = int_to_ptr.vmem [resolvable:$true] %s22_s27 }
   0x5   :  { %s1354_s30 = scalar_lea.hbm %s1775_s1, 128 }
   0x6   :  { %p1355_p0 = scmp.ne.s32.totalorder %s1775_s1, %s1354_s30  ;;  %p1358_p1 = scmp.lt.u32.totalorder %s1354_s30, %s1775_s1 }
   0x8   :  { %p1360_p2 = pnand %p1358_p1, %p1355_p0 }
   0xa   :  { %1363 = shalt.err (!%p1360_p2)
}
   0xb   :  { %s1364_s12 = scalar_lea.vmem %s33_s25, 128  ;;  %p1369_p4 = scmp.lt.s32.totalorder %s33_s25, %s33_s25 }
   0xc   :  { %p1365_p3 = scmp.ne.s32.totalorder %s33_s25, %s1364_s12  ;;  %p1370_p5 = scmp.lt.s32.totalorder %s1364_s12, %s1364_s12 }
   0xe   :  { %p1371_p6 = por %p1370_p5, %p1369_p4 }
  0x10   :  { %p1372_p7 = pnand %p1371_p6, %p1365_p3 }
  0x12   :  { %1375 = shalt.err (!%p1372_p7)
}
  0x13   :  { %35 = dma.hbm_to_vmem [thread:$0]  %s1775_s1, 128, %s33_s25, [#allocation6]  }
  0x14   :  { %s1376_s17 = scalar_lea.hbm %s1774_s0, 128 }
  0x15   :  { %p1377_p8 = scmp.ne.s32.totalorder %s1774_s0, %s1376_s17  ;;  %p1380_p9 = scmp.lt.u32.totalorder %s1376_s17, %s1774_s0 }
  0x17   :  { %p1382_p10 = pnand %p1380_p9, %p1377_p8 }
  0x19   :  { %1385 = shalt.err (!%p1382_p10)
}
  0x1a   :  { %s1386_s22 = scalar_lea.vmem %s23_s27, 128  ;;  %p1391_p12 = scmp.lt.s32.totalorder %s23_s27, %s23_s27 }
  0x1b   :  { %p1387_p11 = scmp.ne.s32.totalorder %s23_s27, %s1386_s22  ;;  %p1392_p13 = scmp.lt.s32.totalorder %s1386_s22, %s1386_s22 }
  0x1d   :  { %p1393_p0 = por %p1392_p13, %p1391_p12 }
  0x1f   :  { %p1394_p1 = pnand %p1393_p0, %p1387_p11 }
  0x21   :  { %1397 = shalt.err (!%p1394_p1)
}
  0x22   :  { %25 = dma.hbm_to_vmem [thread:$0]  %s1774_s0, 128, %s23_s27, [#allocation3]  }
  0x23   :  { %s1474_s24 = smov [#allocation7]   ;;  %s1398_s29 = scalar_lea.hbm %s1777_s3, 6144 }
  0x24   :  { %s43_s25 = sshll.u32 %s1474_s24, 4  ;;  %p1399_p2 = scmp.ne.s32.totalorder %s1777_s3, %s1398_s29  ;;  %s44_s25 = int_to_ptr.vmem [resolvable:$true] %s43_s25 }
  0x25   :  { %p1402_p3 = scmp.lt.u32.totalorder %s1398_s29, %s1777_s3 }
  0x27   :  { %p1404_p4 = pnand %p1402_p3, %p1399_p2 }
  0x29   :  { %1407 = shalt.err (!%p1404_p4)
}
  0x2a   :  { %s1408_s11 = scalar_lea.vmem %s44_s25, 6144  ;;  %p1413_p6 = scmp.lt.s32.totalorder %s44_s25, %s44_s25 }
  0x2b   :  { %p1409_p5 = scmp.ne.s32.totalorder %s44_s25, %s1408_s11  ;;  %p1414_p7 = scmp.lt.s32.totalorder %s1408_s11, %s1408_s11 }
  0x2d   :  { %p1415_p8 = por %p1414_p7, %p1413_p6 }
  0x2f   :  { %p1416_p9 = pnand %p1415_p8, %p1409_p5 }
  0x31   :  { %1419 = shalt.err (!%p1416_p9)
}
  0x32   :  { %s1475_s0 = smov 128   ;;  %s1476_s27 = smov 8  }
  0x33   :  { %49 = dma.hbm_to_vmem [thread:$0]  %s1777_s3, 6144, %s44_s25, [#allocation6], %s1475_s0, %s1475_s0, %s1476_s27  }
  0x34   :  { %s1477_s14 = smov [#allocation8]   ;;  %s1420_s18 = scalar_lea.hbm %s1779_s5, 2048 }
  0x35   :  { %s57_s15 = sshll.u32 %s1477_s14, 4  ;;  %p1421_p10 = scmp.ne.s32.totalorder %s1779_s5, %s1420_s18  ;;  %s58_s15 = int_to_ptr.vmem [resolvable:$true] %s57_s15 }
  0x36   :  { %p1424_p11 = scmp.lt.u32.totalorder %s1420_s18, %s1779_s5 }
  0x38   :  { %p1426_p12 = pnand %p1424_p11, %p1421_p10 }
  0x3a   :  { %1429 = shalt.err (!%p1426_p12)
}
  0x3b   :  { %s1430_s1 = scalar_lea.vmem %s58_s15, 2048  ;;  %p1435_p0 = scmp.lt.s32.totalorder %s58_s15, %s58_s15 }
  0x3c   :  { %p1431_p13 = scmp.ne.s32.totalorder %s58_s15, %s1430_s1  ;;  %p1436_p1 = scmp.lt.s32.totalorder %s1430_s1, %s1430_s1 }
  0x3e   :  { %p1437_p2 = por %p1436_p1, %p1435_p0 }
  0x40   :  { %p1438_p3 = pnand %p1437_p2, %p1431_p13 }
  0x42   :  { %1441 = shalt.err (!%p1438_p3)
}
  0x43   :  { %63 = dma.hbm_to_vmem [thread:$0]  %s1779_s5, 2048, %s58_s15, [#allocation9], %s1475_s0, %s1475_s0, %s1476_s27  }
  0x44   :  { %1464 = dma.done.wait [#allocation3], 128  }
  0x45   :  { %1465 = vsyncadd [#allocation3], 4294967168 }
  0x46   :  { %1466 = dma.done.wait [#allocation6], 6272  }
  0x47   :  { %1467 = vsyncadd [#allocation6], 4294961024 }
  0x48   :  { %1468 = dma.done.wait [#allocation9], 2048  }
  0x49   :  { %1469 = vsyncadd [#allocation9], 4294965248  ;;  %v1478_v0 = vmov 0.0   ;;  %vm1479_vm0 = vmmov 0   ;;  %vm87_vm1 = vcmask 64512   ;;  %v79_v1 = vld [vmem:[#allocation5] sm:$0xff] }
  0x4a   :  { %1065 = vmatprep.subr.mxu0 %v1478_v0  ;;  %1067 = vmatprep.mubr.msk.f32.mxu0 %vm1479_vm0, %v1478_v0  ;;  %v78_v2 = vld [vmem:[#allocation2] sm:$0xff]  ;;  %v265_v3 = vld [vmem:[#allocation7] sm:$0xff]  ;;  %v266_v4 = vld [vmem:[#allocation7 + $0x8] sm:$0xff]  ;;  %v1480_v6 = vmov 0.0|0.0   ;;  %v1481_v42 = vmov 683565275  }
  0x4b   :  { %1102 = vmatprep.mubr.msk.f32.mxu1 %vm1479_vm0, %v1478_v0  ;;  %1066 = vmatpush3.msra.mxu0 %v79_v1  ;;  %v1211_v5 = vpack.c.bf16 %v266_v4, %v265_v3  ;;  %v267_v7 = vld [vmem:[#allocation7 + $0x10] sm:$0xff]  ;;  %v268_v8 = vld [vmem:[#allocation7 + $0x18] sm:$0xff]  ;;  %v269_v10 = vld [vmem:[#allocation7 + $0x20] sm:$0xff]  ;;  %v1482_v44 = vmov 2475754826   ;;  %s1487_s9 = smov [#allocation10]  }
  0x4c   :  { %1068 = vmatmul.mubr.msk.f32.vlgmr.msra.gmra.mrb[0].mxu0 %vm87_vm1, %v78_v2  ;;  %1210 = vmatprep.subr.bf16.mxu1 %v1480_v6  ;;  %v1214_v9 = vpack.c.bf16 %v268_v8, %v267_v7  ;;  %v270_v11 = vld [vmem:[#allocation7 + $0x28] sm:$0xff]  ;;  %v271_v13 = vld [vmem:[#allocation7 + $0x30] sm:$0xff]  ;;  %v272_v14 = vld [vmem:[#allocation7 + $0x38] sm:$0xff]  ;;  %v1483_v47 = vmov 2131351028   ;;  %s960_s10 = sshll.u32 %s1487_s9, 4  ;;  %s961_s10 = int_to_ptr.vmem [resolvable:$true] %s960_s10 }
  0x4d   :  { %1137 = vmatprep.mubr.msk.f32.mxu0 %vm1479_vm0, %v1478_v0  ;;  %1234 = vmatprep.subr.bf16.mxu0 %v1480_v6  ;;  %v1217_v12 = vpack.c.bf16 %v270_v11, %v269_v10  ;;  %v1220_v15 = vpack.c.bf16 %v272_v14, %v271_v13  ;;  %v273_v16 = vld [vmem:[#allocation7 + $0x40] sm:$0xff]  ;;  %v274_v17 = vld [vmem:[#allocation7 + $0x48] sm:$0xff]  ;;  %v275_v19 = vld [vmem:[#allocation7 + $0x50] sm:$0xff]  ;;  %v1484_v50 = vmov 2102212464   ;;  %s1442_s11 = scalar_lea.vmem %s961_s10, 128  ;;  %p1447_p5 = scmp.lt.s32.totalorder %s961_s10, %s961_s10 }
  0x4e   :  { %1212 = vmatpush3.bf16.msra.mxu1 %v1211_v5  ;;  %v1223_v18 = vpack.c.bf16 %v274_v17, %v273_v16  ;;  %v276_v20 = vld [vmem:[#allocation7 + $0x58] sm:$0xff]  ;;  %v277_v22 = vld [vmem:[#allocation7 + $0x60] sm:$0xff]  ;;  %v278_v23 = vld [vmem:[#allocation7 + $0x68] sm:$0xff]  ;;  %v1485_v53 = vmov 920167782   ;;  %p1443_p4 = scmp.ne.s32.totalorder %s961_s10, %s1442_s11  ;;  %p1448_p6 = scmp.lt.s32.totalorder %s1442_s11, %s1442_s11 }
  0x4f   :  { %1213 = vmatprep.subr.bf16.mxu1 %v1480_v6  ;;  %v1226_v21 = vpack.c.bf16 %v276_v20, %v275_v19  ;;  %v1229_v24 = vpack.c.bf16 %v278_v23, %v277_v22  ;;  %v279_v25 = vld [vmem:[#allocation7 + $0x70] sm:$0xff]  ;;  %v280_v26 = vld [vmem:[#allocation7 + $0x78] sm:$0xff]  ;;  %v1486_v56 = vmov 1326507024  }
  0x50   :  { %v1232_v27 = vpack.c.bf16 %v280_v26, %v279_v25  ;;  %v971_v28 = vld [vmem:[%s1776_s2] ss:$0 sm:$0xff]  ;;  %p1449_p7 = por %p1448_p6, %p1447_p5 }
  0x52   :  { %1215 = vmatpush3.bf16.msra.mxu1 %v1214_v9  ;;  %p1450_p8 = pnand %p1449_p7, %p1443_p4 }
  0x53   :  { %1216 = vmatprep.subr.bf16.mxu1 %v1480_v6 }
  0x56   :  { %1218 = vmatpush3.bf16.msra.mxu1 %v1217_v12 }
  0x57   :  { %1219 = vmatprep.subr.bf16.mxu1 %v1480_v6 }
  0x5a   :  { %1221 = vmatpush3.bf16.msra.mxu1 %v1220_v15 }
  0x5b   :  { %1222 = vmatprep.subr.bf16.mxu1 %v1480_v6 }
  0x5e   :  { %1224 = vmatpush3.bf16.msra.mxu1 %v1223_v18 }
  0x5f   :  { %1225 = vmatprep.subr.bf16.mxu1 %v1480_v6 }
  0x62   :  { %1227 = vmatpush3.bf16.msra.mxu1 %v1226_v21 }
  0x63   :  { %1228 = vmatprep.subr.bf16.mxu1 %v1480_v6 }
  0x66   :  { %1230 = vmatpush3.bf16.msra.mxu1 %v1229_v24 }
  0x67   :  { %1231 = vmatprep.subr.bf16.mxu1 %v1480_v6 }
  0x6a   :  { %1233 = vmatpush3.bf16.msra.mxu1 %v1232_v27 }
  0x6b   :  { %1258 = vmatprep.subr.bf16.mxu1 %v1480_v6 }
 0x11f   :  { %v157_v29 = vpop.f32.mrb[0].mxu0 }
 0x120   :  { %v1596_v30 = vadd.f32 %v971_v28, %v157_v29  ;;  %v1069_v31 = vpop.f32.mrb[1].mxu0 }
 0x122   :  { %v164_v32 = vand.u32 2139095040, %v1596_v30  ;;  %v161_v36 = vand.u32 2147483647, %v1596_v30  ;;  %vm163_vm9 = vcmp.lt.s32.totalorder %v1596_v30, 0  ;;  %vm253_vm14 = vweird.f32 %v1596_v30 }
 0x124   :  { %v165_v33 = vshrl.u32 %v164_v32, 23  ;;  %v168_v39 = vand.u32 8388607, %v161_v36  ;;  %vm162_vm10 = vcmp.le.f32.partialorder %v161_v36, 0.7853982 }
 0x126   :  { %v973_v34 = vadd.s32 4294967169, %v165_v33  ;;  %v169_v58 = vor.u32 8388608, %v168_v39 }
 0x128   :  { %v171_v35 = vadd.s32 1, %v973_v34  ;;  %v209_v10 = vshll.u32 %v169_v58, 8 }
 0x12a   :  { %vm172_vm2 = vcmp.gt.s32.totalorder %v171_v35, 0 }
 0x12b   :  { %v173_v37 = vsel %vm172_vm2, %v171_v35, 0 }
 0x12c   :  { %v175_v38 = vand.u32 31, %v173_v37  ;;  %v174_v41 = vshrl.u32 %v173_v37, 5 }
 0x12e   :  { %v176_v40 = vsub.s32 32, %v175_v38  ;;  %v178_v43 = vshll.u32 %v1481_v42, %v175_v38  ;;  %v181_v45 = vshll.u32 %v1482_v44, %v175_v38  ;;  %v184_v49 = vshll.u32 %v1483_v47, %v175_v38 }
 0x12f   :  { %v187_v52 = vshll.u32 %v1484_v50, %v175_v38  ;;  %v190_v55 = vshll.u32 %v1485_v53, %v175_v38  ;;  %vm193_vm3 = vcmp.lt.s32.totalorder %v174_v41, 1  ;;  %vm196_vm4 = vcmp.lt.s32.totalorder %v174_v41, 4 }
 0x130   :  { %v179_v46 = vshrl.u32 %v1482_v44, %v176_v40  ;;  %v182_v48 = vshrl.u32 %v1483_v47, %v176_v40  ;;  %v185_v51 = vshrl.u32 %v1484_v50, %v176_v40  ;;  %v188_v54 = vshrl.u32 %v1485_v53, %v176_v40 }
 0x131   :  { %v191_v57 = vshrl.u32 %v1486_v56, %v176_v40  ;;  %v177_v4 = vshrl.u32 %v1481_v42, %v176_v40  ;;  %vm195_vm5 = vcmp.lt.s32.totalorder %v174_v41, 3  ;;  %vm194_vm6 = vcmp.lt.s32.totalorder %v174_v41, 2 }
 0x132   :  { %v180_v59 = vor.u32 %v179_v46, %v178_v43  ;;  %v183_v60 = vor.u32 %v182_v48, %v181_v45  ;;  %v186_v61 = vor.u32 %v185_v51, %v184_v49  ;;  %v189_v62 = vor.u32 %v188_v54, %v187_v52 }
 0x133   :  { %v192_v63 = vor.u32 %v191_v57, %v190_v55 }
 0x134   :  { %v198_v1 = vsel %vm196_vm4, %v186_v61, 2102212464  ;;  %v201_v2 = vsel %vm193_vm3, %v180_v59, %v183_v60  ;;  %v205_v3 = vsel %vm193_vm3, %v183_v60, %v186_v61  ;;  %v202_v5 = vsel %vm196_vm4, %v189_v62, 920167782 }
 0x135   :  { %v206_v7 = vsel %vm196_vm4, %v192_v63, 1326507024  ;;  %v203_v8 = vsel %vm195_vm5, %v186_v61, %v202_v5  ;;  %v197_v11 = vsel %vm193_vm3, %v177_v4, %v180_v59  ;;  %v199_v12 = vsel %vm195_vm5, %v183_v60, %v198_v1  ;;  %v463_v5 = vld [vmem:[#allocation7 + $0x80] sm:$0xff] }
 0x136   :  { %v207_v9 = vsel %vm195_vm5, %v189_v62, %v206_v7  ;;  %v204_v13 = vsel %vm194_vm6, %v201_v2, %v203_v8  ;;  %v200_v19 = vsel %vm194_vm6, %v197_v11, %v199_v12  ;;  %v464_v7 = vld [vmem:[#allocation7 + $0x88] sm:$0xff]  ;;  %v467_v12 = vld [vmem:[#allocation7 + $0xa0] sm:$0xff] }
 0x137   :  { %v208_v14 = vsel %vm194_vm6, %v205_v3, %v207_v9  ;;  %v1616_v17 = vmul.u32.u64.low %v209_v10, %v204_v13  ;;  %v1617_v18 = vmul.u32.u64.high %v209_v10, %v204_v13, %v1616_v17  ;;  %v216_v21 = vmul.u32 %v209_v10, %v200_v19  ;;  %v465_v9 = vld [vmem:[#allocation7 + $0x90] sm:$0xff] }
 0x138   :  { %v1613_v15 = vmul.u32.u64.low %v209_v10, %v208_v14  ;;  %v1614_v16 = vmul.u32.u64.high %v209_v10, %v208_v14, %v1613_v15  ;;  %v1235_v8 = vpack.c.bf16 %v464_v7, %v463_v5  ;;  %v466_v10 = vld [vmem:[#allocation7 + $0x98] sm:$0xff]  ;;  %v469_v14 = vld [vmem:[#allocation7 + $0xb0] sm:$0xff] }
 0x139   :  { %v219_v20 = vadd.s32 1, %v1617_v18  ;;  %v1238_v11 = vpack.c.bf16 %v466_v10, %v465_v9  ;;  %v470_v15 = vld [vmem:[#allocation7 + $0xb8] sm:$0xff] }
 0x13a   :  { %vm218_vm7 = vc.u32 %v1614_v16, %v1616_v17  ;;  %v217_v34 = vadd.s32 %v1616_v17, %v1614_v16  ;;  %1236 = vmatpush3.bf16.msra.mxu0 %v1235_v8  ;;  %v1244_v16 = vpack.c.bf16 %v470_v15, %v469_v14  ;;  %v471_v17 = vld [vmem:[#allocation7 + $0xc0] sm:$0xff] }
 0x13b   :  { %v220_v22 = vsel %vm218_vm7, %v219_v20, %v1617_v18  ;;  %1237 = vmatprep.subr.bf16.mxu0 %v1480_v6  ;;  %v472_v18 = vld [vmem:[#allocation7 + $0xc8] sm:$0xff]  ;;  %v473_v20 = vld [vmem:[#allocation7 + $0xd0] sm:$0xff] }
 0x13c   :  { %v221_v23 = vadd.s32 %v220_v22, %v216_v21  ;;  %v1247_v19 = vpack.c.bf16 %v472_v18, %v471_v17  ;;  %v474_v21 = vld [vmem:[#allocation7 + $0xd8] sm:$0xff] }
 0x13d   :  { %v1250_v22 = vpack.c.bf16 %v474_v21, %v473_v20 }
 0x13e   :  { %v222_v24 = vadd.s32 536870912, %v221_v23  ;;  %1239 = vmatpush3.bf16.msra.mxu0 %v1238_v11 }
 0x13f   :  { %1240 = vmatprep.subr.bf16.mxu0 %v1480_v6 }
 0x140   :  { %v223_v25 = vshrl.u32 %v222_v24, 30  ;;  %v476_v24 = vld [vmem:[#allocation7 + $0xe8] sm:$0xff] }
 0x142   :  { %v224_v26 = vshll.u32 %v223_v25, 30  ;;  %v247_v51 = vsub.s32 4, %v223_v25 }
 0x144   :  { %v225_v27 = vsub.s32 %v221_v23, %v224_v26  ;;  %v248_v55 = vsel %vm163_vm9, %v247_v51, %v223_v25  ;;  %v475_v23 = vld [vmem:[#allocation7 + $0xe0] sm:$0xff]  ;;  %v477_v26 = vld [vmem:[#allocation7 + $0xf0] sm:$0xff] }
 0x145   :  { %v250_v58 = vsel %vm162_vm10, 0, %v248_v55  ;;  %v1253_v25 = vpack.c.bf16 %v476_v24, %v475_v23 }
 0x146   :  { %v227_v28 = vsub.s32 0, %v225_v27  ;;  %v254_v59 = vadd.s32 3, %v250_v58 }
 0x148   :  { %v974_v29 = vmin.u32 %v227_v28, %v225_v27  ;;  %v255_v60 = vand.u32 3, %v254_v59 }
 0x14a   :  { %v229_v31 = vclz %v974_v29  ;;  %vm260_vm11 = vcmp.eq.s32.totalorder %v255_v60, 2  ;;  %vm257_vm12 = vcmp.eq.s32.totalorder %v255_v60, 0  ;;  %vm256_vm13 = vcmp.lt.s32.totalorder %v255_v60, 2  ;;  %v977_v29 = vld [vmem:[%s1778_s4] ss:$0 sm:$0xff] }
 0x14c   :  { %v975_v32 = vadd.s32 4294967294, %v229_v31 }
 0x14e   :  { %vm976_vm8 = vcmp.lt.s32.totalorder %v975_v32, 0 }
 0x14f   :  { %v232_v33 = vsel %vm976_vm8, 0, %v975_v32 }
 0x150   :  { %v233_v35 = vsub.s32 32, %v232_v33  ;;  %v237_v37 = vsub.s32 4294967266, %v232_v33  ;;  %v234_v38 = vshll.u32 %v225_v27, %v232_v33  ;;  %v478_v27 = vld [vmem:[#allocation7 + $0xf8] sm:$0xff] }
 0x151   :  { %v1256_v28 = vpack.c.bf16 %v478_v27, %v477_v26 }
 0x152   :  { %v235_v39 = vshrl.u32 %v217_v34, %v233_v35  ;;  %v238_v40 = vadd.s32 127, %v237_v37 }
 0x154   :  { %v236_v41 = vor.u32 %v235_v39, %v234_v38  ;;  %v239_v43 = vshll.u32 %v238_v40, 23 }
 0x156   :  { %v240_v45 = vor.u32 4788187, %v239_v43  ;;  %v243_v48 = vcvt.s32.f32 %v236_v41 }
 0x158   :  { %v241_v46 = vand.u32 2147483647, %v240_v45 }
 0x15a   :  { %v244_v49 = vmul.f32 %v243_v48, %v241_v46 }
 0x15c   :  { %v245_v52 = vxor.u32 2147483648, %v244_v49 }
 0x15e   :  { %v246_v54 = vsel %vm163_vm9, %v245_v52, %v244_v49 }
 0x15f   :  { %v249_v57 = vsel %vm162_vm10, %v1596_v30, %v246_v54  ;;  %v468_v30 = vld [vmem:[#allocation7 + $0xa8] sm:$0xff] }
 0x160   :  { %1338 = vcosq.f32 %v249_v57  ;;  %v1241_v13 = vpack.c.bf16 %v468_v30, %v467_v12 }
 0x161   :  { %1340 = vsinq.f32 %v249_v57 }
 0x162   :  { %1242 = vmatpush3.bf16.msra.mxu0 %v1241_v13 }
 0x163   :  { %1243 = vmatprep.subr.bf16.mxu0 %v1480_v6 }
 0x166   :  { %1245 = vmatpush3.bf16.msra.mxu0 %v1244_v16 }
 0x167   :  { %1246 = vmatprep.subr.bf16.mxu0 %v1480_v6 }
 0x16a   :  { %v1339_v61 = vpop.eup %1338  ;;  %1248 = vmatpush3.bf16.msra.mxu0 %v1247_v19 }
 0x16b   :  { %v1341_v62 = vpop.eup %1340  ;;  %v261_v63 = vxor.u32 2147483648, %v1339_v61  ;;  %1249 = vmatprep.subr.bf16.mxu0 %v1480_v6 }
 0x16c   :  { %v258_v1 = vxor.u32 2147483648, %v1341_v62 }
 0x16d   :  { %v262_v2 = vsel %vm260_vm11, %v261_v63, %v1341_v62 }
 0x16e   :  { %v259_v3 = vsel %vm257_vm12, %v1339_v61, %v258_v1  ;;  %1251 = vmatpush3.bf16.msra.mxu0 %v1250_v22 }
 0x16f   :  { %v263_v36 = vsel %vm256_vm13, %v259_v3, %v262_v2  ;;  %1252 = vmatprep.subr.bf16.mxu0 %v1480_v6 }
 0x170   :  { %v264_v4 = vsel %vm253_vm14, nan, %v263_v36 }
 0x171   :  { %1103 = vmatmul.mubr.f32.vlgmr.msra.gmra.mrb[0].mxu1 %v264_v4 }
 0x172   :  { %1172 = vmatprep.mubr.msk.f32.mxu1 %vm1479_vm0, %v1478_v0  ;;  %1254 = vmatpush3.bf16.msra.mxu0 %v1253_v25 }
 0x173   :  { %1255 = vmatprep.subr.bf16.mxu0 %v1480_v6 }
 0x176   :  { %1257 = vmatpush3.bf16.msra.mxu0 %v1256_v28 }
 0x177   :  { %1282 = vmatprep.subr.bf16.mxu0 %v1480_v6 }
 0x244   :  { %v354_v31 = vpop.f32.mrb[0].mxu1 }
 0x245   :  { %v1641_v32 = vadd.f32 %v977_v29, %v354_v31  ;;  %v1104_v33 = vpop.f32.mrb[1].mxu1 }
 0x247   :  { %v361_v34 = vand.u32 2139095040, %v1641_v32  ;;  %v358_v39 = vand.u32 2147483647, %v1641_v32  ;;  %vm360_vm7 = vcmp.lt.s32.totalorder %v1641_v32, 0  ;;  %vm450_vm12 = vweird.f32 %v1641_v32 }
 0x249   :  { %v362_v35 = vshrl.u32 %v361_v34, 23  ;;  %v365_v43 = vand.u32 8388607, %v358_v39  ;;  %vm359_vm8 = vcmp.le.f32.partialorder %v358_v39, 0.7853982 }
 0x24b   :  { %v978_v37 = vadd.s32 4294967169, %v362_v35  ;;  %v366_v61 = vor.u32 8388608, %v365_v43 }
 0x24d   :  { %v368_v38 = vadd.s32 1, %v978_v37  ;;  %v406_v12 = vshll.u32 %v366_v61, 8 }
 0x24f   :  { %vm369_vm15 = vcmp.gt.s32.totalorder %v368_v38, 0 }
 0x250   :  { %v370_v40 = vsel %vm369_vm15, %v368_v38, 0 }
 0x251   :  { %v372_v41 = vand.u32 31, %v370_v40  ;;  %v371_v46 = vshrl.u32 %v370_v40, 5 }
 0x253   :  { %v373_v45 = vsub.s32 32, %v372_v41  ;;  %v375_v48 = vshll.u32 %v1481_v42, %v372_v41  ;;  %v378_v49 = vshll.u32 %v1482_v44, %v372_v41  ;;  %v381_v54 = vshll.u32 %v1483_v47, %v372_v41 }
 0x254   :  { %v384_v57 = vshll.u32 %v1484_v50, %v372_v41  ;;  %v387_v59 = vshll.u32 %v1485_v53, %v372_v41  ;;  %vm390_vm1 = vcmp.lt.s32.totalorder %v371_v46, 1  ;;  %vm393_vm2 = vcmp.lt.s32.totalorder %v371_v46, 4 }
 0x255   :  { %v376_v51 = vshrl.u32 %v1482_v44, %v373_v45  ;;  %v379_v52 = vshrl.u32 %v1483_v47, %v373_v45  ;;  %v382_v55 = vshrl.u32 %v1484_v50, %v373_v45  ;;  %v385_v58 = vshrl.u32 %v1485_v53, %v373_v45 }
 0x256   :  { %v388_v60 = vshrl.u32 %v1486_v56, %v373_v45  ;;  %v374_v7 = vshrl.u32 %v1481_v42, %v373_v45  ;;  %vm392_vm3 = vcmp.lt.s32.totalorder %v371_v46, 3  ;;  %vm391_vm4 = vcmp.lt.s32.totalorder %v371_v46, 2 }
 0x257   :  { %v377_v62 = vor.u32 %v376_v51, %v375_v48  ;;  %v380_v63 = vor.u32 %v379_v52, %v378_v49  ;;  %v383_v1 = vor.u32 %v382_v55, %v381_v54  ;;  %v386_v2 = vor.u32 %v385_v58, %v384_v57 }
 0x258   :  { %v389_v3 = vor.u32 %v388_v60, %v387_v59 }
 0x259   :  { %v395_v36 = vsel %vm393_vm2, %v383_v1, 2102212464  ;;  %v398_v4 = vsel %vm390_vm1, %v377_v62, %v380_v63  ;;  %v402_v5 = vsel %vm390_vm1, %v380_v63, %v383_v1  ;;  %v399_v8 = vsel %vm393_vm2, %v386_v2, 920167782 }
 0x25a   :  { %v403_v9 = vsel %vm393_vm2, %v389_v3, 1326507024  ;;  %v400_v10 = vsel %vm392_vm3, %v383_v1, %v399_v8  ;;  %v394_v30 = vsel %vm390_vm1, %v374_v7, %v377_v62  ;;  %v396_v13 = vsel %vm392_vm3, %v380_v63, %v395_v36  ;;  %v662_v8 = vld [vmem:[#allocation7 + $0x100] sm:$0xff] }
 0x25b   :  { %v404_v11 = vsel %vm392_vm3, %v386_v2, %v403_v9  ;;  %v401_v14 = vsel %vm391_vm4, %v398_v4, %v400_v10  ;;  %v397_v20 = vsel %vm391_vm4, %v394_v30, %v396_v13  ;;  %v663_v9 = vld [vmem:[#allocation7 + $0x108] sm:$0xff]  ;;  %v666_v13 = vld [vmem:[#allocation7 + $0x120] sm:$0xff] }
 0x25c   :  { %v405_v15 = vsel %vm391_vm4, %v402_v5, %v404_v11  ;;  %v1661_v18 = vmul.u32.u64.low %v406_v12, %v401_v14  ;;  %v1662_v19 = vmul.u32.u64.high %v406_v12, %v401_v14, %v1661_v18  ;;  %v413_v22 = vmul.u32 %v406_v12, %v397_v20  ;;  %v664_v11 = vld [vmem:[#allocation7 + $0x110] sm:$0xff] }
 0x25d   :  { %v1658_v16 = vmul.u32.u64.low %v406_v12, %v405_v15  ;;  %v1659_v17 = vmul.u32.u64.high %v406_v12, %v405_v15, %v1658_v16  ;;  %v1259_v10 = vpack.c.bf16 %v663_v9, %v662_v8  ;;  %v665_v12 = vld [vmem:[#allocation7 + $0x118] sm:$0xff]  ;;  %v668_v15 = vld [vmem:[#allocation7 + $0x130] sm:$0xff] }
 0x25e   :  { %v416_v21 = vadd.s32 1, %v1662_v19  ;;  %v1262_v30 = vpack.c.bf16 %v665_v12, %v664_v11  ;;  %v672_v20 = vld [vmem:[#allocation7 + $0x150] sm:$0xff] }
 0x25f   :  { %vm415_vm5 = vc.u32 %v1659_v17, %v1661_v18  ;;  %v414_v37 = vadd.s32 %v1661_v18, %v1659_v17  ;;  %1260 = vmatpush3.bf16.msra.mxu1 %v1259_v10  ;;  %v670_v17 = vld [vmem:[#allocation7 + $0x140] sm:$0xff]  ;;  %v671_v18 = vld [vmem:[#allocation7 + $0x148] sm:$0xff] }
 0x260   :  { %v417_v23 = vsel %vm415_vm5, %v416_v21, %v1662_v19  ;;  %1261 = vmatprep.subr.bf16.mxu1 %v1480_v6  ;;  %v1271_v19 = vpack.c.bf16 %v671_v18, %v670_v17  ;;  %v673_v21 = vld [vmem:[#allocation7 + $0x158] sm:$0xff] }
 0x261   :  { %v418_v24 = vadd.s32 %v417_v23, %v413_v22  ;;  %v1274_v22 = vpack.c.bf16 %v673_v21, %v672_v20  ;;  %v674_v23 = vld [vmem:[#allocation7 + $0x160] sm:$0xff] }
 0x263   :  { %v419_v25 = vadd.s32 536870912, %v418_v24  ;;  %1263 = vmatpush3.bf16.msra.mxu1 %v1262_v30 }
 0x264   :  { %1264 = vmatprep.subr.bf16.mxu1 %v1480_v6 }
 0x265   :  { %v420_v26 = vshrl.u32 %v419_v25, 30 }
 0x267   :  { %v421_v27 = vshll.u32 %v420_v26, 30  ;;  %v444_v55 = vsub.s32 4, %v420_v26 }
 0x269   :  { %v422_v28 = vsub.s32 %v418_v24, %v421_v27  ;;  %v445_v59 = vsel %vm360_vm7, %v444_v55, %v420_v26  ;;  %v675_v24 = vld [vmem:[#allocation7 + $0x168] sm:$0xff]  ;;  %v676_v26 = vld [vmem:[#allocation7 + $0x170] sm:$0xff]  ;;  %v677_v27 = vld [vmem:[#allocation7 + $0x178] sm:$0xff] }
 0x26a   :  { %v447_v61 = vsel %vm359_vm8, 0, %v445_v59  ;;  %v1277_v25 = vpack.c.bf16 %v675_v24, %v674_v23 }
 0x26b   :  { %v424_v29 = vsub.s32 0, %v422_v28  ;;  %v451_v62 = vadd.s32 3, %v447_v61 }
 0x26d   :  { %v979_v31 = vmin.u32 %v424_v29, %v422_v28  ;;  %v452_v63 = vand.u32 3, %v451_v62  ;;  %v983_v29 = vld [vmem:[%s1778_s4 + $0x1] ss:$0 sm:$0xff] }
 0x26f   :  { %v426_v33 = vclz %v979_v31  ;;  %vm457_vm9 = vcmp.eq.s32.totalorder %v452_v63, 2  ;;  %vm454_vm10 = vcmp.eq.s32.totalorder %v452_v63, 0  ;;  %vm453_vm11 = vcmp.lt.s32.totalorder %v452_v63, 2 }
 0x271   :  { %v980_v34 = vadd.s32 4294967294, %v426_v33 }
 0x273   :  { %vm981_vm6 = vcmp.lt.s32.totalorder %v980_v34, 0 }
 0x274   :  { %v429_v35 = vsel %vm981_vm6, 0, %v980_v34 }
 0x275   :  { %v430_v38 = vsub.s32 32, %v429_v35  ;;  %v434_v40 = vsub.s32 4294967266, %v429_v35  ;;  %v431_v41 = vshll.u32 %v422_v28, %v429_v35  ;;  %v1280_v28 = vpack.c.bf16 %v677_v27, %v676_v26 }
 0x277   :  { %v432_v43 = vshrl.u32 %v414_v37, %v430_v38  ;;  %v435_v45 = vadd.s32 127, %v434_v40 }
 0x279   :  { %v433_v46 = vor.u32 %v432_v43, %v431_v41  ;;  %v436_v48 = vshll.u32 %v435_v45, 23 }
 0x27b   :  { %v437_v49 = vor.u32 4788187, %v436_v48  ;;  %v440_v52 = vcvt.s32.f32 %v433_v46 }
 0x27d   :  { %v438_v51 = vand.u32 2147483647, %v437_v49 }
 0x27f   :  { %v441_v54 = vmul.f32 %v440_v52, %v438_v51 }
 0x281   :  { %v442_v57 = vxor.u32 2147483648, %v441_v54 }
 0x283   :  { %v443_v58 = vsel %vm360_vm7, %v442_v57, %v441_v54 }
 0x284   :  { %v446_v60 = vsel %vm359_vm8, %v1641_v32, %v443_v58  ;;  %v667_v32 = vld [vmem:[#allocation7 + $0x128] sm:$0xff] }
 0x285   :  { %1342 = vcosq.f32 %v446_v60  ;;  %v1265_v14 = vpack.c.bf16 %v667_v32, %v666_v13 }
 0x286   :  { %1344 = vsinq.f32 %v446_v60 }
 0x287   :  { %1266 = vmatpush3.bf16.msra.mxu1 %v1265_v14 }
 0x288   :  { %1267 = vmatprep.subr.bf16.mxu1 %v1480_v6 }
 0x28f   :  { %v1343_v1 = vpop.eup %1342 }
 0x290   :  { %v1345_v2 = vpop.eup %1344  ;;  %v458_v3 = vxor.u32 2147483648, %v1343_v1 }
 0x291   :  { %v455_v36 = vxor.u32 2147483648, %v1345_v2 }
 0x292   :  { %v459_v4 = vsel %vm457_vm9, %v458_v3, %v1345_v2 }
 0x293   :  { %v456_v5 = vsel %vm454_vm10, %v1343_v1, %v455_v36 }
 0x294   :  { %v460_v39 = vsel %vm453_vm11, %v456_v5, %v459_v4 }
 0x295   :  { %v461_v7 = vsel %vm450_vm12, nan, %v460_v39 }
 0x296   :  { %1138 = vmatmul.mubr.f32.vlgmr.msra.gmra.mrb[2].mxu0 %v461_v7 }
 0x297   :  { %1207 = vmatprep.mubr.msk.f32.mxu0 %vm1479_vm0, %v1478_v0  ;;  %v669_v0 = vld [vmem:[#allocation7 + $0x138] sm:$0xff] }
 0x298   :  { %v1268_v16 = vpack.c.bf16 %v669_v0, %v668_v15 }
 0x29a   :  { %1269 = vmatpush3.bf16.msra.mxu1 %v1268_v16 }
 0x29b   :  { %1270 = vmatprep.subr.bf16.mxu1 %v1480_v6 }
 0x29e   :  { %1272 = vmatpush3.bf16.msra.mxu1 %v1271_v19 }
 0x29f   :  { %1273 = vmatprep.subr.bf16.mxu1 %v1480_v6 }
 0x2a2   :  { %1275 = vmatpush3.bf16.msra.mxu1 %v1274_v22 }
 0x2a3   :  { %1276 = vmatprep.subr.bf16.mxu1 %v1480_v6 }
 0x2a6   :  { %1278 = vmatpush3.bf16.msra.mxu1 %v1277_v25 }
 0x2a7   :  { %1279 = vmatprep.subr.bf16.mxu1 %v1480_v6 }
 0x2aa   :  { %1281 = vmatpush3.bf16.msra.mxu1 %v1280_v28 }
 0x369   :  { %v553_v31 = vpop.f32.mrb[2].mxu0 }
 0x36a   :  { %v1685_v33 = vadd.f32 %v983_v29, %v553_v31  ;;  %v1139_v34 = vpop.f32.mrb[3].mxu0 }
 0x36c   :  { %v560_v35 = vand.u32 2139095040, %v1685_v33  ;;  %v557_v41 = vand.u32 2147483647, %v1685_v33  ;;  %vm559_vm4 = vcmp.lt.s32.totalorder %v1685_v33, 0  ;;  %vm649_vm9 = vweird.f32 %v1685_v33 }
 0x36e   :  { %v561_v37 = vshrl.u32 %v560_v35, 23  ;;  %v564_v46 = vand.u32 8388607, %v557_v41  ;;  %vm558_vm5 = vcmp.le.f32.partialorder %v557_v41, 0.7853982 }
 0x370   :  { %v984_v38 = vadd.s32 4294967169, %v561_v37  ;;  %v565_v63 = vor.u32 8388608, %v564_v46 }
 0x372   :  { %v567_v40 = vadd.s32 1, %v984_v38  ;;  %v605_v30 = vshll.u32 %v565_v63, 8 }
 0x374   :  { %vm568_vm0 = vcmp.gt.s32.totalorder %v567_v40, 0 }
 0x375   :  { %v569_v43 = vsel %vm568_vm0, %v567_v40, 0 }
 0x376   :  { %v571_v45 = vand.u32 31, %v569_v43  ;;  %v570_v49 = vshrl.u32 %v569_v43, 5 }
 0x378   :  { %v572_v48 = vsub.s32 32, %v571_v45  ;;  %v574_v51 = vshll.u32 %v1481_v42, %v571_v45  ;;  %v577_v52 = vshll.u32 %v1482_v44, %v571_v45  ;;  %v580_v57 = vshll.u32 %v1483_v47, %v571_v45 }
 0x379   :  { %v583_v59 = vshll.u32 %v1484_v50, %v571_v45  ;;  %v586_v61 = vshll.u32 %v1485_v53, %v571_v45  ;;  %vm589_vm13 = vcmp.lt.s32.totalorder %v570_v49, 1  ;;  %vm592_vm14 = vcmp.lt.s32.totalorder %v570_v49, 4 }
 0x37a   :  { %v575_v54 = vshrl.u32 %v1482_v44, %v572_v48  ;;  %v578_v55 = vshrl.u32 %v1483_v47, %v572_v48  ;;  %v581_v58 = vshrl.u32 %v1484_v50, %v572_v48  ;;  %v584_v60 = vshrl.u32 %v1485_v53, %v572_v48 }
 0x37b   :  { %v587_v62 = vshrl.u32 %v1486_v56, %v572_v48  ;;  %v573_v8 = vshrl.u32 %v1481_v42, %v572_v48  ;;  %vm591_vm15 = vcmp.lt.s32.totalorder %v570_v49, 3  ;;  %vm590_vm1 = vcmp.lt.s32.totalorder %v570_v49, 2 }
 0x37c   :  { %v576_v1 = vor.u32 %v575_v54, %v574_v51  ;;  %v579_v2 = vor.u32 %v578_v55, %v577_v52  ;;  %v582_v3 = vor.u32 %v581_v58, %v580_v57  ;;  %v585_v36 = vor.u32 %v584_v60, %v583_v59 }
 0x37d   :  { %v588_v4 = vor.u32 %v587_v62, %v586_v61 }
 0x37e   :  { %v594_v5 = vsel %vm592_vm14, %v582_v3, 2102212464  ;;  %v597_v39 = vsel %vm589_vm13, %v576_v1, %v579_v2  ;;  %v601_v7 = vsel %vm589_vm13, %v579_v2, %v582_v3  ;;  %v598_v9 = vsel %vm592_vm14, %v585_v36, 920167782 }
 0x37f   :  { %v602_v10 = vsel %vm592_vm14, %v588_v4, 1326507024  ;;  %v599_v11 = vsel %vm591_vm15, %v582_v3, %v598_v9  ;;  %v593_v13 = vsel %vm589_vm13, %v573_v8, %v576_v1  ;;  %v595_v32 = vsel %vm591_vm15, %v579_v2, %v594_v5  ;;  %v860_v8 = vld [vmem:[#allocation8] sm:$0xff]  ;;  %v861_v9 = vld [vmem:[#allocation8 + $0x8] sm:$0xff] }
 0x380   :  { %v603_v12 = vsel %vm591_vm15, %v585_v36, %v602_v10  ;;  %v600_v14 = vsel %vm590_vm1, %v597_v39, %v599_v11  ;;  %v596_v19 = vsel %vm590_vm1, %v593_v13, %v595_v32  ;;  %v1283_v10 = vpack.c.bf16 %v861_v9, %v860_v8  ;;  %v862_v11 = vld [vmem:[#allocation8 + $0x10] sm:$0xff]  ;;  %v864_v13 = vld [vmem:[#allocation8 + $0x20] sm:$0xff]  ;;  %v865_v32 = vld [vmem:[#allocation8 + $0x28] sm:$0xff] }
 0x381   :  { %v604_v15 = vsel %vm590_vm1, %v601_v7, %v603_v12  ;;  %v1705_v17 = vmul.u32.u64.low %v605_v30, %v600_v14  ;;  %v1706_v18 = vmul.u32.u64.high %v605_v30, %v600_v14, %v1705_v17  ;;  %v612_v21 = vmul.u32 %v605_v30, %v596_v19  ;;  %v863_v12 = vld [vmem:[#allocation8 + $0x18] sm:$0xff]  ;;  %v870_v19 = vld [vmem:[#allocation8 + $0x50] sm:$0xff] }
 0x382   :  { %v1702_v0 = vmul.u32.u64.low %v605_v30, %v604_v15  ;;  %v1703_v16 = vmul.u32.u64.high %v605_v30, %v604_v15, %v1702_v0  ;;  %1284 = vmatpush3.bf16.msra.mxu0 %v1283_v10  ;;  %v1286_v30 = vpack.c.bf16 %v863_v12, %v862_v11  ;;  %v1289_v14 = vpack.c.bf16 %v865_v32, %v864_v13  ;;  %v867_v15 = vld [vmem:[#allocation8 + $0x38] sm:$0xff] }
 0x383   :  { %v615_v20 = vadd.s32 1, %v1706_v18  ;;  %1285 = vmatprep.subr.bf16.mxu0 %v1480_v6 }
 0x384   :  { %vm614_vm2 = vc.u32 %v1703_v16, %v1705_v17  ;;  %v613_v37 = vadd.s32 %v1705_v17, %v1703_v16  ;;  %v868_v16 = vld [vmem:[#allocation8 + $0x40] sm:$0xff]  ;;  %v869_v17 = vld [vmem:[#allocation8 + $0x48] sm:$0xff] }
 0x385   :  { %v616_v22 = vsel %vm614_vm2, %v615_v20, %v1706_v18  ;;  %v1295_v18 = vpack.c.bf16 %v869_v17, %v868_v16  ;;  %v871_v20 = vld [vmem:[#allocation8 + $0x58] sm:$0xff] }
 0x386   :  { %v617_v23 = vadd.s32 %v616_v22, %v612_v21  ;;  %1287 = vmatpush3.bf16.msra.mxu0 %v1286_v30  ;;  %v1298_v21 = vpack.c.bf16 %v871_v20, %v870_v19  ;;  %v872_v22 = vld [vmem:[#allocation8 + $0x60] sm:$0xff] }
 0x387   :  { %1288 = vmatprep.subr.bf16.mxu0 %v1480_v6 }
 0x388   :  { %v618_v24 = vadd.s32 536870912, %v617_v23 }
 0x38a   :  { %v619_v25 = vshrl.u32 %v618_v24, 30  ;;  %1290 = vmatpush3.bf16.msra.mxu0 %v1289_v14 }
 0x38b   :  { %1291 = vmatprep.subr.bf16.mxu0 %v1480_v6 }
 0x38c   :  { %v620_v26 = vshll.u32 %v619_v25, 30  ;;  %v643_v57 = vsub.s32 4, %v619_v25 }
 0x38e   :  { %v621_v27 = vsub.s32 %v617_v23, %v620_v26  ;;  %v644_v60 = vsel %vm559_vm4, %v643_v57, %v619_v25  ;;  %v873_v23 = vld [vmem:[#allocation8 + $0x68] sm:$0xff]  ;;  %v874_v25 = vld [vmem:[#allocation8 + $0x70] sm:$0xff]  ;;  %v875_v26 = vld [vmem:[#allocation8 + $0x78] sm:$0xff] }
 0x38f   :  { %v646_v62 = vsel %vm558_vm5, 0, %v644_v60  ;;  %v1301_v24 = vpack.c.bf16 %v873_v23, %v872_v22 }
 0x390   :  { %v623_v28 = vsub.s32 0, %v621_v27  ;;  %v650_v63 = vadd.s32 3, %v646_v62 }
 0x392   :  { %v985_v29 = vmin.u32 %v623_v28, %v621_v27  ;;  %v651_v1 = vand.u32 3, %v650_v63  ;;  %v989_v28 = vld [vmem:[%s1778_s4 + $0x2] ss:$0 sm:$0xff] }
 0x394   :  { %v625_v31 = vclz %v985_v29  ;;  %vm656_vm6 = vcmp.eq.s32.totalorder %v651_v1, 2  ;;  %vm653_vm7 = vcmp.eq.s32.totalorder %v651_v1, 0  ;;  %vm652_vm8 = vcmp.lt.s32.totalorder %v651_v1, 2 }
 0x396   :  { %v986_v34 = vadd.s32 4294967294, %v625_v31 }
 0x398   :  { %vm987_vm3 = vcmp.lt.s32.totalorder %v986_v34, 0 }
 0x399   :  { %v628_v35 = vsel %vm987_vm3, 0, %v986_v34 }
 0x39a   :  { %v629_v38 = vsub.s32 32, %v628_v35  ;;  %v633_v40 = vsub.s32 4294967266, %v628_v35  ;;  %v630_v43 = vshll.u32 %v621_v27, %v628_v35  ;;  %v1304_v27 = vpack.c.bf16 %v875_v26, %v874_v25 }
 0x39c   :  { %v631_v45 = vshrl.u32 %v613_v37, %v629_v38  ;;  %v634_v46 = vadd.s32 127, %v633_v40 }
 0x39e   :  { %v632_v48 = vor.u32 %v631_v45, %v630_v43  ;;  %v635_v49 = vshll.u32 %v634_v46, 23 }
 0x3a0   :  { %v636_v51 = vor.u32 4788187, %v635_v49  ;;  %v639_v54 = vcvt.s32.f32 %v632_v48 }
 0x3a2   :  { %v637_v52 = vand.u32 2147483647, %v636_v51 }
 0x3a4   :  { %v640_v55 = vmul.f32 %v639_v54, %v637_v52 }
 0x3a6   :  { %v641_v58 = vxor.u32 2147483648, %v640_v55 }
 0x3a8   :  { %v642_v59 = vsel %vm559_vm4, %v641_v58, %v640_v55 }
 0x3a9   :  { %v645_v61 = vsel %vm558_vm5, %v1685_v33, %v642_v59  ;;  %v866_v33 = vld [vmem:[#allocation8 + $0x30] sm:$0xff] }
 0x3aa   :  { %1346 = vcosq.f32 %v645_v61  ;;  %v1292_v0 = vpack.c.bf16 %v867_v15, %v866_v33 }
 0x3ab   :  { %1348 = vsinq.f32 %v645_v61 }
 0x3ac   :  { %1293 = vmatpush3.bf16.msra.mxu0 %v1292_v0 }
 0x3ad   :  { %1294 = vmatprep.subr.bf16.mxu0 %v1480_v6 }
 0x3b0   :  { %1296 = vmatpush3.bf16.msra.mxu0 %v1295_v18 }
 0x3b1   :  { %1297 = vmatprep.subr.bf16.mxu0 %v1480_v6 }
 0x3b4   :  { %v1347_v2 = vpop.eup %1346  ;;  %1299 = vmatpush3.bf16.msra.mxu0 %v1298_v21 }
 0x3b5   :  { %v1349_v3 = vpop.eup %1348  ;;  %v657_v36 = vxor.u32 2147483648, %v1347_v2  ;;  %1300 = vmatprep.subr.bf16.mxu0 %v1480_v6 }
 0x3b6   :  { %v654_v4 = vxor.u32 2147483648, %v1349_v3 }
 0x3b7   :  { %v658_v5 = vsel %vm656_vm6, %v657_v36, %v1349_v3 }
 0x3b8   :  { %v655_v39 = vsel %vm653_vm7, %v1347_v2, %v654_v4  ;;  %1302 = vmatpush3.bf16.msra.mxu0 %v1301_v24 }
 0x3b9   :  { %v659_v41 = vsel %vm652_vm8, %v655_v39, %v658_v5  ;;  %1303 = vmatprep.subr.bf16.mxu0 %v1480_v6 }
 0x3ba   :  { %v660_v7 = vsel %vm649_vm9, nan, %v659_v41 }
 0x3bb   :  { %1173 = vmatmul.mubr.f32.vlgmr.msra.gmra.mrb[2].mxu1 %v660_v7 }
 0x3bc   :  { %1305 = vmatpush3.bf16.msra.mxu0 %v1304_v27 }
 0x48e   :  { %v752_v29 = vpop.f32.mrb[2].mxu1 }
 0x48f   :  { %v1727_v31 = vadd.f32 %v989_v28, %v752_v29  ;;  %v1174_v34 = vpop.f32.mrb[3].mxu1 }
 0x491   :  { %v759_v35 = vand.u32 2139095040, %v1727_v31  ;;  %v756_v43 = vand.u32 2147483647, %v1727_v31  ;;  %vm758_vm1 = vcmp.lt.s32.totalorder %v1727_v31, 0  ;;  %vm848_vm6 = vweird.f32 %v1727_v31 }
 0x493   :  { %v760_v37 = vshrl.u32 %v759_v35, 23  ;;  %v763_v6 = vand.u32 8388607, %v756_v43  ;;  %vm757_vm2 = vcmp.le.f32.partialorder %v756_v43, 0.7853982 }
 0x495   :  { %v990_v38 = vadd.s32 4294967169, %v760_v37  ;;  %v764_v63 = vor.u32 8388608, %v763_v6 }
 0x497   :  { %v766_v40 = vadd.s32 1, %v990_v38 }
 0x499   :  { %vm767_vm10 = vcmp.gt.s32.totalorder %v766_v40, 0 }
 0x49a   :  { %v768_v45 = vsel %vm767_vm10, %v766_v40, 0 }
 0x49b   :  { %v770_v46 = vand.u32 31, %v768_v45  ;;  %v769_v49 = vshrl.u32 %v768_v45, 5 }
 0x49d   :  { %v771_v48 = vsub.s32 32, %v770_v46  ;;  %v773_v51 = vshll.u32 %v1481_v42, %v770_v46  ;;  %v776_v52 = vshll.u32 %v1482_v44, %v770_v46  ;;  %v779_v57 = vshll.u32 %v1483_v47, %v770_v46 }
 0x49e   :  { %v782_v59 = vshll.u32 %v1484_v50, %v770_v46  ;;  %v785_v61 = vshll.u32 %v1485_v53, %v770_v46  ;;  %vm788_vm11 = vcmp.lt.s32.totalorder %v769_v49, 1  ;;  %vm791_vm12 = vcmp.lt.s32.totalorder %v769_v49, 4 }
 0x49f   :  { %v774_v54 = vshrl.u32 %v1482_v44, %v771_v48  ;;  %v777_v55 = vshrl.u32 %v1483_v47, %v771_v48  ;;  %v780_v58 = vshrl.u32 %v1484_v50, %v771_v48  ;;  %v783_v60 = vshrl.u32 %v1485_v53, %v771_v48 }
 0x4a0   :  { %v786_v62 = vshrl.u32 %v1486_v56, %v771_v48  ;;  %v772_v39 = vshrl.u32 %v1481_v42, %v771_v48  ;;  %vm790_vm0 = vcmp.lt.s32.totalorder %v769_v49, 3  ;;  %vm789_vm13 = vcmp.lt.s32.totalorder %v769_v49, 2 }
 0x4a1   :  { %v775_v1 = vor.u32 %v774_v54, %v773_v51  ;;  %v778_v2 = vor.u32 %v777_v55, %v776_v52  ;;  %v781_v3 = vor.u32 %v780_v58, %v779_v57  ;;  %v784_v36 = vor.u32 %v783_v60, %v782_v59 }
 0x4a2   :  { %v787_v44 = vor.u32 %v786_v62, %v785_v61  ;;  %v804_v56 = vshll.u32 %v764_v63, 8 }
 0x4a3   :  { %v793_v4 = vsel %vm791_vm12, %v781_v3, 2102212464  ;;  %v796_v47 = vsel %vm788_vm11, %v775_v1, %v778_v2  ;;  %v800_v5 = vsel %vm788_vm11, %v778_v2, %v781_v3  ;;  %v797_v50 = vsel %vm791_vm12, %v784_v36, 920167782 }
 0x4a4   :  { %v801_v41 = vsel %vm791_vm12, %v787_v44, 1326507024  ;;  %v798_v53 = vsel %vm790_vm0, %v781_v3, %v797_v50  ;;  %v792_v8 = vsel %vm788_vm11, %v772_v39, %v775_v1  ;;  %v794_v9 = vsel %vm790_vm0, %v778_v2, %v793_v4  ;;  %v994_v2 = vld [vmem:[%s1780_s6] ss:$0 sm:$0xff] }
 0x4a5   :  { %v802_v7 = vsel %vm790_vm0, %v784_v36, %v801_v41  ;;  %v799_v10 = vsel %vm789_vm13, %v796_v47, %v798_v53  ;;  %v795_v14 = vsel %vm789_vm13, %v792_v8, %v794_v9 }
 0x4a6   :  { %v803_v11 = vsel %vm789_vm13, %v800_v5, %v802_v7  ;;  %v1747_v13 = vmul.u32.u64.low %v804_v56, %v799_v10  ;;  %v1748_v32 = vmul.u32.u64.high %v804_v56, %v799_v10, %v1747_v13  ;;  %v811_v33 = vmul.u32 %v804_v56, %v795_v14 }
 0x4a7   :  { %v1744_v12 = vmul.u32.u64.low %v804_v56, %v803_v11  ;;  %v1745_v30 = vmul.u32.u64.high %v804_v56, %v803_v11, %v1744_v12 }
 0x4a8   :  { %v814_v42 = vadd.s32 1, %v1748_v32 }
 0x4a9   :  { %vm813_vm14 = vc.u32 %v1745_v30, %v1747_v13  ;;  %v812_v25 = vadd.s32 %v1747_v13, %v1745_v30 }
 0x4aa   :  { %v815_v15 = vsel %vm813_vm14, %v814_v42, %v1748_v32 }
 0x4ab   :  { %v816_v0 = vadd.s32 %v815_v15, %v811_v33 }
 0x4ad   :  { %v817_v16 = vadd.s32 536870912, %v816_v0 }
 0x4af   :  { %v818_v17 = vshrl.u32 %v817_v16, 30 }
 0x4b1   :  { %v819_v18 = vshll.u32 %v818_v17, 30  ;;  %v842_v6 = vsub.s32 4, %v818_v17 }
 0x4b3   :  { %v820_v19 = vsub.s32 %v816_v0, %v819_v18  ;;  %v843_v51 = vsel %vm758_vm1, %v842_v6, %v818_v17 }
 0x4b4   :  { %v845_v54 = vsel %vm757_vm2, 0, %v843_v51 }
 0x4b5   :  { %v822_v20 = vsub.s32 0, %v820_v19  ;;  %v849_v55 = vadd.s32 3, %v845_v54 }
 0x4b7   :  { %v991_v21 = vmin.u32 %v822_v20, %v820_v19  ;;  %v850_v57 = vand.u32 3, %v849_v55 }
 0x4b9   :  { %v824_v22 = vclz %v991_v21  ;;  %vm855_vm3 = vcmp.eq.s32.totalorder %v850_v57, 2  ;;  %vm852_vm4 = vcmp.eq.s32.totalorder %v850_v57, 0  ;;  %vm851_vm5 = vcmp.lt.s32.totalorder %v850_v57, 2 }
 0x4bb   :  { %v992_v23 = vadd.s32 4294967294, %v824_v22 }
 0x4bd   :  { %vm993_vm15 = vcmp.lt.s32.totalorder %v992_v23, 0 }
 0x4be   :  { %v827_v24 = vsel %vm993_vm15, 0, %v992_v23 }
 0x4bf   :  { %v828_v26 = vsub.s32 32, %v827_v24  ;;  %v832_v27 = vsub.s32 4294967266, %v827_v24  ;;  %v829_v28 = vshll.u32 %v820_v19, %v827_v24 }
 0x4c1   :  { %v830_v29 = vshrl.u32 %v812_v25, %v828_v26  ;;  %v833_v34 = vadd.s32 127, %v832_v27 }
 0x4c3   :  { %v831_v35 = vor.u32 %v830_v29, %v829_v28  ;;  %v834_v37 = vshll.u32 %v833_v34, 23 }
 0x4c5   :  { %v835_v38 = vor.u32 4788187, %v834_v37  ;;  %v838_v45 = vcvt.s32.f32 %v831_v35 }
 0x4c7   :  { %v836_v40 = vand.u32 2147483647, %v835_v38 }
 0x4c9   :  { %v839_v46 = vmul.f32 %v838_v45, %v836_v40 }
 0x4cb   :  { %v840_v48 = vxor.u32 2147483648, %v839_v46 }
 0x4cd   :  { %v841_v49 = vsel %vm758_vm1, %v840_v48, %v839_v46 }
 0x4ce   :  { %v844_v52 = vsel %vm757_vm2, %v1727_v31, %v841_v49 }
 0x4cf   :  { %1350 = vcosq.f32 %v844_v52 }
 0x4d0   :  { %1352 = vsinq.f32 %v844_v52 }
 0x4d9   :  { %v1351_v58 = vpop.eup %1350 }
 0x4da   :  { %v1353_v59 = vpop.eup %1352  ;;  %v856_v60 = vxor.u32 2147483648, %v1351_v58 }
 0x4db   :  { %v853_v61 = vxor.u32 2147483648, %v1353_v59 }
 0x4dc   :  { %v857_v62 = vsel %vm855_vm3, %v856_v60, %v1353_v59 }
 0x4dd   :  { %v854_v63 = vsel %vm852_vm4, %v1351_v58, %v853_v61 }
 0x4de   :  { %v858_v43 = vsel %vm851_vm5, %v854_v63, %v857_v62 }
 0x4df   :  { %v859_v1 = vsel %vm848_vm6, nan, %v858_v43 }
 0x4e0   :  { %1208 = vmatmul.mubr.f32.vlgmr.msra.gmra.mrb[4].mxu0 %v859_v1 }
 0x5b3   :  { %v949_v3 = vpop.f32.mrb[4].mxu0 }
 0x5b4   :  { %v950_v36 = vadd.f32 %v994_v2, %v949_v3  ;;  %v1209_v44 = vpop.f32.mrb[5].mxu0 }
 0x5b6   :  { %953 = vst [vmem:[#allocation10] sm:$0xff] %v950_v36 }
 0x5b7   :  { %1453 = shalt.err (!%p1450_p8)
}
 0x5b8   :  { %s1454_s12 = scalar_lea.hbm %s1781_s7, 128 }
 0x5b9   :  { %p1455_p9 = scmp.ne.s32.totalorder %s1781_s7, %s1454_s12  ;;  %p1458_p10 = scmp.lt.u32.totalorder %s1454_s12, %s1781_s7 }
 0x5bb   :  { %p1460_p11 = pnand %p1458_p10, %p1455_p9 }
 0x5bd   :  { %1463 = shalt.err (!%p1460_p11)
}
 0x5be   :  { %963 = dma.vmem_to_hbm [thread:$0]  %s961_s10, 128, %s1781_s7, [#allocation4]  }
 0x5bf   :  { %1470 = dma.done.wait [#allocation4], 128  }
 0x5c0   :  { %1471 = vsyncadd [#allocation4], 4294967168 }
 0x5c1   :  { %967 = vsyncpa [#allocation3], 1 }
 0x5c2   :  { %968 = vsyncpa [#allocation6], 1 }
 0x5c3   :  { %969 = vsyncpa [#allocation9], 1 }
 0x5c4   :  { %970 = vsyncpa [#allocation4], 1 }

</bundles_post_ra>
